<compile_context>
chip_gen: v6e
topology: v6e:2x2x1
jax: 0.10.0
libtpu: 0.0.40
codegen_flags: <defaults>
</compile_context>

<pallas_src>
import functools

import jax
import jax.numpy as jnp
from jax.experimental import pallas as pl
from jax.experimental.pallas import tpu as pltpu


# ------------------------------------------------------------------ helpers

def _row_tile(m, pref=256):
    """Largest row tile <= pref that divides m (multiple of 8 when possible)."""
    if m <= pref:
        return m
    for t in range(pref, 7, -8):
        if m % t == 0:
            return t
    return m


# ------------------------------------------------------------------ matmul (+bias) kernels

def _matmul_bias_kernel(x_ref, w_ref, b_ref, o_ref):
    acc = jnp.dot(x_ref[...], w_ref[...], preferred_element_type=jnp.float32)
    o_ref[...] = (acc + b_ref[...].astype(jnp.float32)).astype(o_ref.dtype)


def matmul_bias(x, w, b, *, tile_m=256):
    """(M,K) @ (K,N) + (N,), row-tiled with resident weights."""
    M, K = x.shape
    N = w.shape[1]
    tm = _row_tile(M, tile_m)
    return pl.pallas_call(
        _matmul_bias_kernel,
        out_shape=jax.ShapeDtypeStruct((M, N), x.dtype),
        grid=(M // tm,),
        in_specs=[pl.BlockSpec((tm, K), lambda i: (i, 0)),
                  pl.BlockSpec((K, N), lambda i: (0, 0)),     # weight resident across M tiles
                  pl.BlockSpec((1, N), lambda i: (0, 0))],
        out_specs=pl.BlockSpec((tm, N), lambda i: (i, 0)),
        compiler_params=pltpu.CompilerParams(dimension_semantics=("parallel",)),
    )(x, w, b.reshape(1, N))


def _matmul_bias_res_kernel(x_ref, w_ref, b_ref, r_ref, o_ref):
    acc = jnp.dot(x_ref[...], w_ref[...], preferred_element_type=jnp.float32)
    o_ref[...] = (acc + b_ref[...].astype(jnp.float32)
                  + r_ref[...].astype(jnp.float32)).astype(o_ref.dtype)


def matmul_bias_residual(x, w, b, res, *, tile_m=256):
    """out = x @ w + b + res   (attention output projection + residual add fused)."""
    M, K = x.shape
    N = w.shape[1]
    tm = _row_tile(M, tile_m)
    return pl.pallas_call(
        _matmul_bias_res_kernel,
        out_shape=jax.ShapeDtypeStruct((M, N), x.dtype),
        grid=(M // tm,),
        in_specs=[pl.BlockSpec((tm, K), lambda i: (i, 0)),
                  pl.BlockSpec((K, N), lambda i: (0, 0)),
                  pl.BlockSpec((1, N), lambda i: (0, 0)),
                  pl.BlockSpec((tm, N), lambda i: (i, 0))],
        out_specs=pl.BlockSpec((tm, N), lambda i: (i, 0)),
        compiler_params=pltpu.CompilerParams(dimension_semantics=("parallel",)),
    )(x, w, b.reshape(1, N), res)


def _ln_matmul_kernel(x_ref, g_ref, bln_ref, w_ref, b_ref, o_ref, *, eps):
    x = x_ref[...].astype(jnp.float32)
    mu = jnp.mean(x, axis=-1, keepdims=True)
    var = jnp.mean(jnp.square(x - mu), axis=-1, keepdims=True)
    xn = (x - mu) * jax.lax.rsqrt(var + eps)
    xn = xn * g_ref[...].astype(jnp.float32) + bln_ref[...].astype(jnp.float32)
    acc = jnp.dot(xn.astype(w_ref.dtype), w_ref[...], preferred_element_type=jnp.float32)
    o_ref[...] = (acc + b_ref[...].astype(jnp.float32)).astype(o_ref.dtype)


def ln_matmul_bias(x, g, bln, w, b, *, eps=1e-6, tile_m=256):
    """out = LayerNorm(x) @ w + b   (LN fused into the QKV projection)."""
    M, K = x.shape
    N = w.shape[1]
    tm = _row_tile(M, tile_m)
    return pl.pallas_call(
        functools.partial(_ln_matmul_kernel, eps=eps),
        out_shape=jax.ShapeDtypeStruct((M, N), x.dtype),
        grid=(M // tm,),
        in_specs=[pl.BlockSpec((tm, K), lambda i: (i, 0)),
                  pl.BlockSpec((1, K), lambda i: (0, 0)),
                  pl.BlockSpec((1, K), lambda i: (0, 0)),
                  pl.BlockSpec((K, N), lambda i: (0, 0)),
                  pl.BlockSpec((1, N), lambda i: (0, 0))],
        out_specs=pl.BlockSpec((tm, N), lambda i: (i, 0)),
        compiler_params=pltpu.CompilerParams(dimension_semantics=("parallel",)),
    )(x, g.reshape(1, K), bln.reshape(1, K), w, b.reshape(1, N))


def _matmul_ln_kernel(x_ref, w_ref, g_ref, b_ref, o_ref, *, eps):
    y = jnp.dot(x_ref[...], w_ref[...], preferred_element_type=jnp.float32)
    mu = jnp.mean(y, axis=-1, keepdims=True)
    var = jnp.mean(jnp.square(y - mu), axis=-1, keepdims=True)
    yn = (y - mu) * jax.lax.rsqrt(var + eps)
    o_ref[...] = (yn * g_ref[...].astype(jnp.float32)
                  + b_ref[...].astype(jnp.float32)).astype(o_ref.dtype)


def matmul_ln(x, w, g, b, *, eps=1e-6, tile_m=256):
    """out = LayerNorm2d(x @ w)   (neck 1x1 conv, bias-free, + channel LN fused)."""
    M, K = x.shape
    N = w.shape[1]
    tm = _row_tile(M, tile_m)
    return pl.pallas_call(
        functools.partial(_matmul_ln_kernel, eps=eps),
        out_shape=jax.ShapeDtypeStruct((M, N), x.dtype),
        grid=(M // tm,),
        in_specs=[pl.BlockSpec((tm, K), lambda i: (i, 0)),
                  pl.BlockSpec((K, N), lambda i: (0, 0)),
                  pl.BlockSpec((1, N), lambda i: (0, 0)),
                  pl.BlockSpec((1, N), lambda i: (0, 0))],
        out_specs=pl.BlockSpec((tm, N), lambda i: (i, 0)),
        compiler_params=pltpu.CompilerParams(dimension_semantics=("parallel",)),
    )(x, w, g.reshape(1, N), b.reshape(1, N))


# ------------------------------------------------------------------ flash attention

def _flash_attn_kernel(q_ref, k_ref, v_ref, o_ref, m_sc, l_sc, acc_sc, *, scale):
    kv = pl.program_id(2)

    @pl.when(kv == 0)
    def _():
        m_sc[...] = jnp.full_like(m_sc, -jnp.inf)
        l_sc[...] = jnp.zeros_like(l_sc)
        acc_sc[...] = jnp.zeros_like(acc_sc)

    q = q_ref[0].astype(jnp.float32) * scale                       # (tq, dh)
    k = k_ref[0].astype(jnp.float32)                               # (tk, dh)
    s = jax.lax.dot_general(q, k, (((1,), (1,)), ((), ())),
                            preferred_element_type=jnp.float32)    # (tq, tk)
    m_new = jnp.maximum(m_sc[...], jnp.max(s, axis=-1, keepdims=True))
    alpha = jnp.exp(m_sc[...] - m_new)
    p = jnp.exp(s - m_new)
    l_sc[...] = alpha * l_sc[...] + jnp.sum(p, axis=-1, keepdims=True)
    acc_sc[...] = alpha * acc_sc[...] + jnp.dot(p.astype(v_ref.dtype), v_ref[0],
                                                preferred_element_type=jnp.float32)
    m_sc[...] = m_new

    @pl.when(kv == pl.num_programs(2) - 1)
    def _():
        o_ref[0] = (acc_sc[...] * pl.reciprocal(l_sc[...], approx=True)).astype(o_ref.dtype)


def flash_attention(q, k, v, *, tile_q=256, tile_kv=256):
    """q, k, v: (B*heads, N, dh) -> (B*heads, N, dh). Online-softmax, kv tiled."""
    # TODO(synk): SAM/ViTDet attention optionally adds decomposed rel-pos bias and windowing;
    #             plain global MHA is implemented here.
    BH, N, dh = q.shape
    scale = dh ** -0.5
    tq = _row_tile(N, tile_q)
    tk = _row_tile(N, tile_kv)
    return pl.pallas_call(
        functools.partial(_flash_attn_kernel, scale=scale),
        out_shape=jax.ShapeDtypeStruct((BH, N, dh), q.dtype),
        grid=(BH, N // tq, N // tk),
        in_specs=[pl.BlockSpec((1, tq, dh), lambda bh, qi, ki: (bh, qi, 0)),
                  pl.BlockSpec((1, tk, dh), lambda bh, qi, ki: (bh, ki, 0)),
                  pl.BlockSpec((1, tk, dh), lambda bh, qi, ki: (bh, ki, 0))],
        out_specs=pl.BlockSpec((1, tq, dh), lambda bh, qi, ki: (bh, qi, 0)),
        scratch_shapes=[pltpu.VMEM((tq, 1), jnp.float32),
                        pltpu.VMEM((tq, 1), jnp.float32),
                        pltpu.VMEM((tq, dh), jnp.float32)],
        compiler_params=pltpu.CompilerParams(
            dimension_semantics=("parallel", "parallel", "arbitrary")),
    )(q, k, v)


# ------------------------------------------------------------------ fused MLP block

def _ln_mlp_res_kernel(x_ref, g_ref, bln_ref, w1_ref, b1_ref, w2_ref, b2_ref, o_ref, *, eps):
    x = x_ref[...].astype(jnp.float32)
    mu = jnp.mean(x, axis=-1, keepdims=True)
    var = jnp.mean(jnp.square(x - mu), axis=-1, keepdims=True)
    xn = (x - mu) * jax.lax.rsqrt(var + eps)
    xn = xn * g_ref[...].astype(jnp.float32) + bln_ref[...].astype(jnp.float32)
    h = jnp.dot(xn.astype(w1_ref.dtype), w1_ref[...],
                preferred_element_type=jnp.float32) + b1_ref[...].astype(jnp.float32)
    # TODO(synk): PyTorch nn.GELU defaults to the exact erf form; tanh approximation used here.
    h = jax.nn.gelu(h, approximate=True)
    out = jnp.dot(h.astype(w2_ref.dtype), w2_ref[...],
                  preferred_element_type=jnp.float32) + b2_ref[...].astype(jnp.float32)
    o_ref[...] = (out + x).astype(o_ref.dtype)           # residual uses pre-LN input


def ln_mlp_residual(x, g, bln, w1, b1, w2, b2, *, eps=1e-6, tile_m=256):
    """out = x + fc2(GELU(fc1(LayerNorm(x)))), row-tiled, hidden never hits HBM."""
    M, D = x.shape
    H = w1.shape[1]
    tm = _row_tile(M, tile_m)
    return pl.pallas_call(
        functools.partial(_ln_mlp_res_kernel, eps=eps),
        out_shape=jax.ShapeDtypeStruct((M, D), x.dtype),
        grid=(M // tm,),
        in_specs=[pl.BlockSpec((tm, D), lambda i: (i, 0)),
                  pl.BlockSpec((1, D), lambda i: (0, 0)),
                  pl.BlockSpec((1, D), lambda i: (0, 0)),
                  pl.BlockSpec((D, H), lambda i: (0, 0)),
                  pl.BlockSpec((1, H), lambda i: (0, 0)),
                  pl.BlockSpec((H, D), lambda i: (0, 0)),
                  pl.BlockSpec((1, D), lambda i: (0, 0))],
        out_specs=pl.BlockSpec((tm, D), lambda i: (i, 0)),
        compiler_params=pltpu.CompilerParams(dimension_semantics=("parallel",)),
    )(x, g.reshape(1, D), bln.reshape(1, D), w1, b1.reshape(1, H), w2, b2.reshape(1, D))


# ------------------------------------------------------------------ neck 3x3 conv (+ LayerNorm2d)

def _conv3x3_ln_kernel(xp_ref, w_ref, g_ref, b_ref, o_ref, *, wp, eps):
    # One output row per grid step: accumulate the 9 taps in-register (no im2col in HBM).
    i = pl.program_id(1)
    co = w_ref.shape[-1]
    acc = jnp.zeros((wp, co), jnp.float32)
    for t in range(9):
        di, dj = divmod(t, 3)
        row = xp_ref[0, i + di, dj:dj + wp, :].astype(jnp.float32)     # (wp, Co)
        acc = acc + jnp.dot(row, w_ref[t].astype(jnp.float32),
                            preferred_element_type=jnp.float32)
    mu = jnp.mean(acc, axis=-1, keepdims=True)
    var = jnp.mean(jnp.square(acc - mu), axis=-1, keepdims=True)
    yn = (acc - mu) * jax.lax.rsqrt(var + eps)
    yn = yn * g_ref[...].astype(jnp.float32) + b_ref[...].astype(jnp.float32)
    o_ref[0, 0] = yn.astype(o_ref.dtype)


def conv3x3_ln(yp, w9, g, b, *, hp, wp, eps=1e-6):
    """yp: zero-padded NHWC map (B, Hp+2, Wp+2, Co); w9: (9, Co, Co). Returns (B, Hp, Wp, Co)."""
    B = yp.shape[0]
    Co = w9.shape[-1]
    return pl.pallas_call(
        functools.partial(_conv3x3_ln_kernel, wp=wp, eps=eps),
        out_shape=jax.ShapeDtypeStruct((B, hp, wp, Co), yp.dtype),
        grid=(B, hp),
        in_specs=[pl.BlockSpec((1, hp + 2, wp + 2, Co), lambda bi, ri: (bi, 0, 0, 0)),
                  pl.BlockSpec((9, Co, Co), lambda bi, ri: (0, 0, 0)),
                  pl.BlockSpec((1, Co), lambda bi, ri: (0, 0)),
                  pl.BlockSpec((1, Co), lambda bi, ri: (0, 0))],
        out_specs=pl.BlockSpec((1, 1, wp, Co), lambda bi, ri: (bi, ri, 0, 0)),
        compiler_params=pltpu.CompilerParams(
            dimension_semantics=("parallel", "arbitrary")),
    )(yp, w9, g.reshape(1, Co), b.reshape(1, Co))


# ------------------------------------------------------------------ parameters

def init_params(key, *, in_chans, patch, embed_dim, depth, num_heads, mlp_ratio,
                out_chans, hp, wp):
    hidden = int(embed_dim * mlp_ratio)
    keys = iter(jax.random.split(key, 8 + 8 * depth))

    def w(shape):
        return jax.random.normal(next(keys), shape, jnp.float32) * 0.02

    params = {
        "patch_w": w((in_chans * patch * patch, embed_dim)),   # Conv2d(k=p, s=p) as matmul
        "patch_b": jnp.zeros((embed_dim,), jnp.float32),
        "pos_embed": w((1, hp, wp, embed_dim)),
        "blocks": [],
        "neck_w1": w((embed_dim, out_chans)),                  # 1x1 conv, bias=False
        "neck_ln1_g": jnp.ones((out_chans,), jnp.float32),
        "neck_ln1_b": jnp.zeros((out_chans,), jnp.float32),
        "neck_w2": w((9, out_chans, out_chans)),               # 3x3 conv taps, bias=False
        "neck_ln2_g": jnp.ones((out_chans,), jnp.float32),
        "neck_ln2_b": jnp.zeros((out_chans,), jnp.float32),
    }
    for _ in range(depth):
        params["blocks"].append({
            "ln1_g": jnp.ones((embed_dim,), jnp.float32),
            "ln1_b": jnp.zeros((embed_dim,), jnp.float32),
            "wqkv": w((embed_dim, 3 * embed_dim)),
            "bqkv": jnp.zeros((3 * embed_dim,), jnp.float32),
            "wproj": w((embed_dim, embed_dim)),
            "bproj": jnp.zeros((embed_dim,), jnp.float32),
            "ln2_g": jnp.ones((embed_dim,), jnp.float32),
            "ln2_b": jnp.zeros((embed_dim,), jnp.float32),
            "w1": w((embed_dim, hidden)),
            "b1": jnp.zeros((hidden,), jnp.float32),
            "w2": w((hidden, embed_dim)),
            "b2": jnp.zeros((embed_dim,), jnp.float32),
        })
    return params


# ------------------------------------------------------------------ forward (VARYQWEN.forward == image_encoder(x))

def varyqwen_forward(x_nchw, params, cfg):
    B, C, H, W = x_nchw.shape
    p = cfg["patch"]
    Hp, Wp = H // p, W // p
    D = cfg["embed_dim"]
    heads = cfg["num_heads"]
    dh = D // heads
    N = Hp * Wp

    # --- patch embedding: Conv2d(C, D, kernel=p, stride=p) as a row-tiled matmul
    patches = (x_nchw.reshape(B, C, Hp, p, Wp, p)
               .transpose(0, 2, 4, 1, 3, 5)                       # (B, Hp, Wp, C, p, p)  [glue]
               .reshape(B * N, C * p * p))
    tokens = matmul_bias(patches, params["patch_w"], params["patch_b"])     # (B*N, D)
    tokens = (tokens.reshape(B, Hp, Wp, D) + params["pos_embed"]).reshape(B * N, D)

    # --- transformer blocks (token-major (B*N, D) throughout)
    for blk in params["blocks"]:
        # attention: fused LN1+QKV  ->  flash attention  ->  fused proj+residual
        qkv = ln_matmul_bias(tokens, blk["ln1_g"], blk["ln1_b"], blk["wqkv"], blk["bqkv"])
        qkv = qkv.reshape(B, N, 3, heads, dh).transpose(2, 0, 3, 1, 4)      # (3,B,heads,N,dh) glue
        q = qkv[0].reshape(B * heads, N, dh)
        k = qkv[1].reshape(B * heads, N, dh)
        v = qkv[2].reshape(B * heads, N, dh)
        attn = flash_attention(q, k, v)                                     # (B*heads, N, dh)
        attn = attn.reshape(B, heads, N, dh).transpose(0, 2, 1, 3).reshape(B * N, D)
        tokens = matmul_bias_residual(attn, blk["wproj"], blk["bproj"], tokens)
        # MLP: fused LN2 + fc1 + GELU + fc2 + residual
        tokens = ln_mlp_residual(tokens, blk["ln2_g"], blk["ln2_b"],
                                 blk["w1"], blk["b1"], blk["w2"], blk["b2"])

    # --- neck: 1x1 conv + LayerNorm2d (fused), 3x3 conv (pad=1) + LayerNorm2d (fused)
    Co = params["neck_w1"].shape[1]
    y = matmul_ln(tokens, params["neck_w1"], params["neck_ln1_g"], params["neck_ln1_b"])
    y = y.reshape(B, Hp, Wp, Co)
    yp = jnp.pad(y, ((0, 0), (1, 1), (1, 1), (0, 0)))                       # glue: zero pad
    y = conv3x3_ln(yp, params["neck_w2"], params["neck_ln2_g"], params["neck_ln2_b"],
                   hp=Hp, wp=Wp)
    return y.transpose(0, 3, 1, 2)                                          # NCHW (B, Co, Hp, Wp)


# ------------------------------------------------------------------ main

if __name__ == "__main__":
    cfg = dict(in_chans=3, patch=16, embed_dim=32, depth=2, num_heads=4,
               mlp_ratio=4.0, out_chans=32)
    B, H, W = 2, 32, 32
    Hp, Wp = H // cfg["patch"], W // cfg["patch"]

    key = jax.random.PRNGKey(0)
    kx, kp = jax.random.split(key)
    x = jax.random.normal(kx, (B, cfg["in_chans"], H, W), jnp.float32)      # NCHW like PyTorch
    params = init_params(kp, hp=Hp, wp=Wp, **cfg)

    fwd = jax.jit(lambda xx, pp: varyqwen_forward(xx, pp, cfg))
    out = fwd(x, params)
    out = jax.block_until_ready(out)
    assert out.shape == (B, cfg["out_chans"], Hp, Wp), out.shape
    assert jnp.all(jnp.isfinite(out))
    print("KERNEL_OK")
</pallas_src>

<mosaic_0001>
module attributes {stable_mosaic.version = 11 : i64} {
  func.func @_matmul_bias_kernel(%arg0: i32, %arg1: memref<8x768xf32, #tpu.memory_space<vmem>>, %arg2: memref<768x32xf32, #tpu.memory_space<vmem>>, %arg3: memref<1x32xf32, #tpu.memory_space<vmem>>, %arg4: memref<8x32xf32, #tpu.memory_space<vmem>>) attributes {dimension_semantics = [#tpu.dimension_semantics<parallel>], iteration_bounds = array<i64: 1>, scalar_prefetch = 0 : i64, scratch_operands = 0 : i64, tpu.core_type = #tpu.core_type<tc>, window_params = [{transform_indices = @transform_0, window_bounds = array<i64: 8, 768>}, {pipeline_mode = #tpu.pipeline_mode<synchronous>, transform_indices = @transform_1, window_bounds = array<i64: 768, 32>}, {pipeline_mode = #tpu.pipeline_mode<synchronous>, transform_indices = @transform_2, window_bounds = array<i64: 1, 32>}, {transform_indices = @transform_3, window_bounds = array<i64: 8, 32>}]} {
    %c0 = arith.constant 0 : index
    %c0_0 = arith.constant 0 : index
    %0 = vector.load %arg1[%c0, %c0_0] : memref<8x768xf32, #tpu.memory_space<vmem>>, vector<8x768xf32>
    %c0_1 = arith.constant 0 : index
    %c0_2 = arith.constant 0 : index
    %1 = vector.load %arg2[%c0_1, %c0_2] : memref<768x32xf32, #tpu.memory_space<vmem>>, vector<768x32xf32>
    %cst = arith.constant dense<0.000000e+00> : vector<8x32xf32>
    %2 = tpu.matmul %0, %1, %cst {dimension_numbers = #tpu.dot_dimension_numbers<[1], [0], [0], [1], [0, 0, 1, 1], [], []>} : vector<8x768xf32>, vector<768x32xf32>, vector<8x32xf32> -> vector<8x32xf32>
    %c0_3 = arith.constant 0 : index
    %c0_4 = arith.constant 0 : index
    %3 = vector.load %arg3[%c0_3, %c0_4] : memref<1x32xf32, #tpu.memory_space<vmem>>, vector<1x32xf32>
    %4 = vector.broadcast %3 : vector<1x32xf32> to vector<8x32xf32>
    %5 = arith.addf %2, %4 : vector<8x32xf32>
    %c0_5 = arith.constant 0 : index
    %c0_6 = arith.constant 0 : index
    %6 = vector.load %arg4[%c0_5, %c0_6] : memref<8x32xf32, #tpu.memory_space<vmem>>, vector<8x32xf32>
    tpu.vector_store %arg4[%c0_5, %c0_6], %5 {strides = array<i32>} : memref<8x32xf32, #tpu.memory_space<vmem>>, vector<8x32xf32>,
    return
  }
  func.func @transform_0(%arg0: i32) -> (i32, i32) {
    %c0_i32 = arith.constant 0 : i32
    %c0_i32_0 = arith.constant 0 : i32
    return %arg0, %c0_i32 : i32, i32
  }
  func.func @transform_1(%arg0: i32) -> (i32, i32) {
    %c0_i32 = arith.constant 0 : i32
    %c0_i32_0 = arith.constant 0 : i32
    %c0_i32_1 = arith.constant 0 : i32
    return %c0_i32, %c0_i32_0 : i32, i32
  }
  func.func @transform_2(%arg0: i32) -> (i32, i32) {
    %c0_i32 = arith.constant 0 : i32
    %c0_i32_0 = arith.constant 0 : i32
    %c0_i32_1 = arith.constant 0 : i32
    return %c0_i32, %c0_i32_0 : i32, i32
  }
  func.func @transform_3(%arg0: i32) -> (i32, i32) {
    %c0_i32 = arith.constant 0 : i32
    %c0_i32_0 = arith.constant 0 : i32
    return %arg0, %c0_i32 : i32, i32
  }
}

module attributes {stable_mosaic.version = 11 : i64} {
  func.func @_ln_matmul_kernel(%arg0: i32, %arg1: memref<8x32xf32, #tpu.memory_space<vmem>>, %arg2: memref<1x32xf32, #tpu.memory_space<vmem>>, %arg3: memref<1x32xf32, #tpu.memory_space<vmem>>, %arg4: memref<32x96xf32, #tpu.memory_space<vmem>>, %arg5: memref<1x96xf32, #tpu.memory_space<vmem>>, %arg6: memref<8x96xf32, #tpu.memory_space<vmem>>) attributes {dimension_semantics = [#tpu.dimension_semantics<parallel>], iteration_bounds = array<i64: 1>, scalar_prefetch = 0 : i64, scratch_operands = 0 : i64, tpu.core_type = #tpu.core_type<tc>, window_params = [{transform_indices = @transform_0, window_bounds = array<i64: 8, 32>}, {pipeline_mode = #tpu.pipeline_mode<synchronous>, transform_indices = @transform_1, window_bounds = array<i64: 1, 32>}, {pipeline_mode = #tpu.pipeline_mode<synchronous>, transform_indices = @transform_2, window_bounds = array<i64: 1, 32>}, {pipeline_mode = #tpu.pipeline_mode<synchronous>, transform_indices = @transform_3, window_bounds = array<i64: 32, 96>}, {pipeline_mode = #tpu.pipeline_mode<synchronous>, transform_indices = @transform_4, window_bounds = array<i64: 1, 96>}, {transform_indices = @transform_5, window_bounds = array<i64: 8, 96>}]} {
    %c0 = arith.constant 0 : index
    %c0_0 = arith.constant 0 : index
    %0 = vector.load %arg1[%c0, %c0_0] : memref<8x32xf32, #tpu.memory_space<vmem>>, vector<8x32xf32>
    %cst = arith.constant dense<0.000000e+00> : vector<8xf32>
    %1 = vector.multi_reduction <add>, %0, %cst [1] : vector<8x32xf32> to vector<8xf32>
    %2 = vector.shape_cast %1 : vector<8xf32> to vector<8x1xf32>
    %cst_1 = arith.constant 3.200000e+01 : f32
    %3 = vector.broadcast %cst_1 : f32 to vector<8x1xf32>
    %4 = arith.divf %2, %3 : vector<8x1xf32>
    %5 = vector.broadcast %4 : vector<8x1xf32> to vector<8x32xf32>
    %6 = arith.subf %0, %5 : vector<8x32xf32>
    %7 = arith.mulf %6, %6 : vector<8x32xf32>
    %cst_2 = arith.constant dense<0.000000e+00> : vector<8xf32>
    %8 = vector.multi_reduction <add>, %7, %cst_2 [1] : vector<8x32xf32> to vector<8xf32>
    %9 = vector.shape_cast %8 : vector<8xf32> to vector<8x1xf32>
    %cst_3 = arith.constant 3.200000e+01 : f32
    %10 = vector.broadcast %cst_3 : f32 to vector<8x1xf32>
    %11 = arith.divf %9, %10 : vector<8x1xf32>
    %12 = vector.broadcast %4 : vector<8x1xf32> to vector<8x32xf32>
    %13 = arith.subf %0, %12 : vector<8x32xf32>
    %cst_4 = arith.constant 9.99999997E-7 : f32
    %14 = vector.broadcast %cst_4 : f32 to vector<8x1xf32>
    %15 = arith.addf %11, %14 : vector<8x1xf32>
    %16 = math.rsqrt %15 : vector<8x1xf32>
    %17 = vector.broadcast %16 : vector<8x1xf32> to vector<8x32xf32>
    %18 = arith.mulf %13, %17 : vector<8x32xf32>
    %c0_5 = arith.constant 0 : index
    %c0_6 = arith.constant 0 : index
    %19 = vector.load %arg2[%c0_5, %c0_6] : memref<1x32xf32, #tpu.memory_space<vmem>>, vector<1x32xf32>
    %20 = vector.broadcast %19 : vector<1x32xf32> to vector<8x32xf32>
    %21 = arith.mulf %18, %20 : vector<8x32xf32>
    %c0_7 = arith.constant 0 : index
    %c0_8 = arith.constant 0 : index
    %22 = vector.load %arg3[%c0_7, %c0_8] : memref<1x32xf32, #tpu.memory_space<vmem>>, vector<1x32xf32>
    %23 = vector.broadcast %22 : vector<1x32xf32> to vector<8x32xf32>
    %24 = arith.addf %21, %23 : vector<8x32xf32>
    %c0_9 = arith.constant 0 : index
    %c0_10 = arith.constant 0 : index
    %25 = vector.load %arg4[%c0_9, %c0_10] : memref<32x96xf32, #tpu.memory_space<vmem>>, vector<32x96xf32>
    %cst_11 = arith.constant dense<0.000000e+00> : vector<8x96xf32>
    %26 = tpu.matmul %24, %25, %cst_11 {dimension_numbers = #tpu.dot_dimension_numbers<[1], [0], [0], [1], [0, 0, 1, 1], [], []>} : vector<8x32xf32>, vector<32x96xf32>, vector<8x96xf32> -> vector<8x96xf32>
    %c0_12 = arith.constant 0 : index
    %c0_13 = arith.constant 0 : index
    %27 = vector.load %arg5[%c0_12, %c0_13] : memref<1x96xf32, #tpu.memory_space<vmem>>, vector<1x96xf32>
    %28 = vector.broadcast %27 : vector<1x96xf32> to vector<8x96xf32>
    %29 = arith.addf %26, %28 : vector<8x96xf32>
    %c0_14 = arith.constant 0 : index
    %c0_15 = arith.constant 0 : index
    %30 = vector.load %arg6[%c0_14, %c0_15] : memref<8x96xf32, #tpu.memory_space<vmem>>, vector<8x96xf32>
    tpu.vector_store %arg6[%c0_14, %c0_15], %29 {strides = array<i32>} : memref<8x96xf32, #tpu.memory_space<vmem>>, vector<8x96xf32>,
    return
  }
  func.func @transform_0(%arg0: i32) -> (i32, i32) {
    %c0_i32 = arith.constant 0 : i32
    %c0_i32_0 = arith.constant 0 : i32
    return %arg0, %c0_i32 : i32, i32
  }
  func.func @transform_1(%arg0: i32) -> (i32, i32) {
    %c0_i32 = arith.constant 0 : i32
    %c0_i32_0 = arith.constant 0 : i32
    %c0_i32_1 = arith.constant 0 : i32
    return %c0_i32, %c0_i32_0 : i32, i32
  }
  func.func @transform_2(%arg0: i32) -> (i32, i32) {
    %c0_i32 = arith.constant 0 : i32
    %c0_i32_0 = arith.constant 0 : i32
    %c0_i32_1 = arith.constant 0 : i32
    return %c0_i32, %c0_i32_0 : i32, i32
  }
  func.func @transform_3(%arg0: i32) -> (i32, i32) {
    %c0_i32 = arith.constant 0 : i32
    %c0_i32_0 = arith.constant 0 : i32
    %c0_i32_1 = arith.constant 0 : i32
    return %c0_i32, %c0_i32_0 : i32, i32
  }
  func.func @transform_4(%arg0: i32) -> (i32, i32) {
    %c0_i32 = arith.constant 0 : i32
    %c0_i32_0 = arith.constant 0 : i32
    %c0_i32_1 = arith.constant 0 : i32
    return %c0_i32, %c0_i32_0 : i32, i32
  }
  func.func @transform_5(%arg0: i32) -> (i32, i32) {
    %c0_i32 = arith.constant 0 : i32
    %c0_i32_0 = arith.constant 0 : i32
    return %arg0, %c0_i32 : i32, i32
  }
}

module attributes {stable_mosaic.version = 11 : i64} {
  func.func @_matmul_bias_res_kernel(%arg0: i32, %arg1: memref<8x32xf32, #tpu.memory_space<vmem>>, %arg2: memref<32x32xf32, #tpu.memory_space<vmem>>, %arg3: memref<1x32xf32, #tpu.memory_space<vmem>>, %arg4: memref<8x32xf32, #tpu.memory_space<vmem>>, %arg5: memref<8x32xf32, #tpu.memory_space<vmem>>) attributes {dimension_semantics = [#tpu.dimension_semantics<parallel>], iteration_bounds = array<i64: 1>, scalar_prefetch = 0 : i64, scratch_operands = 0 : i64, tpu.core_type = #tpu.core_type<tc>, window_params = [{transform_indices = @transform_0, window_bounds = array<i64: 8, 32>}, {pipeline_mode = #tpu.pipeline_mode<synchronous>, transform_indices = @transform_1, window_bounds = array<i64: 32, 32>}, {pipeline_mode = #tpu.pipeline_mode<synchronous>, transform_indices = @transform_2, window_bounds = array<i64: 1, 32>}, {transform_indices = @transform_3, window_bounds = array<i64: 8, 32>}, {transform_indices = @transform_4, window_bounds = array<i64: 8, 32>}]} {
    %c0 = arith.constant 0 : index
    %c0_0 = arith.constant 0 : index
    %0 = vector.load %arg1[%c0, %c0_0] : memref<8x32xf32, #tpu.memory_space<vmem>>, vector<8x32xf32>
    %c0_1 = arith.constant 0 : index
    %c0_2 = arith.constant 0 : index
    %1 = vector.load %arg2[%c0_1, %c0_2] : memref<32x32xf32, #tpu.memory_space<vmem>>, vector<32x32xf32>
    %cst = arith.constant dense<0.000000e+00> : vector<8x32xf32>
    %2 = tpu.matmul %0, %1, %cst {dimension_numbers = #tpu.dot_dimension_numbers<[1], [0], [0], [1], [0, 0, 1, 1], [], []>} : vector<8x32xf32>, vector<32x32xf32>, vector<8x32xf32> -> vector<8x32xf32>
    %c0_3 = arith.constant 0 : index
    %c0_4 = arith.constant 0 : index
    %3 = vector.load %arg3[%c0_3, %c0_4] : memref<1x32xf32, #tpu.memory_space<vmem>>, vector<1x32xf32>
    %4 = vector.broadcast %3 : vector<1x32xf32> to vector<8x32xf32>
    %5 = arith.addf %2, %4 : vector<8x32xf32>
    %c0_5 = arith.constant 0 : index
    %c0_6 = arith.constant 0 : index
    %6 = vector.load %arg4[%c0_5, %c0_6] : memref<8x32xf32, #tpu.memory_space<vmem>>, vector<8x32xf32>
    %7 = arith.addf %5, %6 : vector<8x32xf32>
    %c0_7 = arith.constant 0 : index
    %c0_8 = arith.constant 0 : index
    %8 = vector.load %arg5[%c0_7, %c0_8] : memref<8x32xf32, #tpu.memory_space<vmem>>, vector<8x32xf32>
    tpu.vector_store %arg5[%c0_7, %c0_8], %7 {strides = array<i32>} : memref<8x32xf32, #tpu.memory_space<vmem>>, vector<8x32xf32>,
    return
  }
  func.func @transform_0(%arg0: i32) -> (i32, i32) {
    %c0_i32 = arith.constant 0 : i32
    %c0_i32_0 = arith.constant 0 : i32
    return %arg0, %c0_i32 : i32, i32
  }
  func.func @transform_1(%arg0: i32) -> (i32, i32) {
    %c0_i32 = arith.constant 0 : i32
    %c0_i32_0 = arith.constant 0 : i32
    %c0_i32_1 = arith.constant 0 : i32
    return %c0_i32, %c0_i32_0 : i32, i32
  }
  func.func @transform_2(%arg0: i32) -> (i32, i32) {
    %c0_i32 = arith.constant 0 : i32
    %c0_i32_0 = arith.constant 0 : i32
    %c0_i32_1 = arith.constant 0 : i32
    return %c0_i32, %c0_i32_0 : i32, i32
  }
  func.func @transform_3(%arg0: i32) -> (i32, i32) {
    %c0_i32 = arith.constant 0 : i32
    %c0_i32_0 = arith.constant 0 : i32
    return %arg0, %c0_i32 : i32, i32
  }
  func.func @transform_4(%arg0: i32) -> (i32, i32) {
    %c0_i32 = arith.constant 0 : i32
    %c0_i32_0 = arith.constant 0 : i32
    return %arg0, %c0_i32 : i32, i32
  }
}

module attributes {stable_mosaic.version = 11 : i64} {
  func.func @_flash_attn_kernel(%arg0: i32, %arg1: i32, %arg2: i32, %arg3: memref<1x4x8xf32, #tpu.memory_space<vmem>>, %arg4: memref<1x4x8xf32, #tpu.memory_space<vmem>>, %arg5: memref<1x4x8xf32, #tpu.memory_space<vmem>>, %arg6: memref<1x4x8xf32, #tpu.memory_space<vmem>>, %arg7: memref<4x1xf32, #tpu.memory_space<vmem>>, %arg8: memref<4x1xf32, #tpu.memory_space<vmem>>, %arg9: memref<4x8xf32, #tpu.memory_space<vmem>>) attributes {dimension_semantics = [#tpu.dimension_semantics<parallel>, #tpu.dimension_semantics<parallel>, #tpu.dimension_semantics<arbitrary>], iteration_bounds = array<i64: 8, 1, 1>, scalar_prefetch = 0 : i64, scratch_operands = 3 : i64, tpu.core_type = #tpu.core_type<tc>, window_params = [{transform_indices = @transform_0, window_bounds = array<i64: 1, 4, 8>}, {transform_indices = @transform_1, window_bounds = array<i64: 1, 4, 8>}, {transform_indices = @transform_2, window_bounds = array<i64: 1, 4, 8>}, {transform_indices = @transform_3, window_bounds = array<i64: 1, 4, 8>}]} {
    %c0_i32 = arith.constant 0 : i32
    %0 = arith.cmpi eq, %arg2, %c0_i32 : i32
    %1 = arith.extui %0 : i1 to i32
    %c0_i32_0 = arith.constant 0 : i32
    %2 = arith.cmpi ne, %1, %c0_i32_0 : i32
    scf.if %2 {
      %cst_29 = arith.constant 0xFF800000 : f32
      %38 = vector.broadcast %cst_29 : f32 to vector<4x1xf32>
      %c0_30 = arith.constant 0 : index
      %c0_31 = arith.constant 0 : index
      %39 = vector.load %arg7[%c0_30, %c0_31] : memref<4x1xf32, #tpu.memory_space<vmem>>, vector<4x1xf32>
      tpu.vector_store %arg7[%c0_30, %c0_31], %38 {strides = array<i32>} : memref<4x1xf32, #tpu.memory_space<vmem>>, vector<4x1xf32>,
      %cst_32 = arith.constant 0.000000e+00 : f32
      %40 = vector.broadcast %cst_32 : f32 to vector<4x1xf32>
      %c0_33 = arith.constant 0 : index
      %c0_34 = arith.constant 0 : index
      %41 = vector.load %arg8[%c0_33, %c0_34] : memref<4x1xf32, #tpu.memory_space<vmem>>, vector<4x1xf32>
      tpu.vector_store %arg8[%c0_33, %c0_34], %40 {strides = array<i32>} : memref<4x1xf32, #tpu.memory_space<vmem>>, vector<4x1xf32>,
      %cst_35 = arith.constant 0.000000e+00 : f32
      %42 = vector.broadcast %cst_35 : f32 to vector<4x8xf32>
      %c0_36 = arith.constant 0 : index
      %c0_37 = arith.constant 0 : index
      %43 = vector.load %arg9[%c0_36, %c0_37] : memref<4x8xf32, #tpu.memory_space<vmem>>, vector<4x8xf32>
      tpu.vector_store %arg9[%c0_36, %c0_37], %42 {strides = array<i32>} : memref<4x8xf32, #tpu.memory_space<vmem>>, vector<4x8xf32>,
    } else {
    }
    %c0 = arith.constant 0 : index
    %c0_1 = arith.constant 0 : index
    %c0_2 = arith.constant 0 : index
    %3 = vector.load %arg3[%c0, %c0_1, %c0_2] : memref<1x4x8xf32, #tpu.memory_space<vmem>>, vector<1x4x8xf32>
    %4 = vector.shape_cast %3 : vector<1x4x8xf32> to vector<4x8xf32>
    %cst = arith.constant 0.353553385 : f32
    %5 = vector.broadcast %cst : f32 to vector<4x8xf32>
    %6 = arith.mulf %4, %5 : vector<4x8xf32>
    %c0_3 = arith.constant 0 : index
    %c0_4 = arith.constant 0 : index
    %c0_5 = arith.constant 0 : index
    %7 = vector.load %arg4[%c0_3, %c0_4, %c0_5] : memref<1x4x8xf32, #tpu.memory_space<vmem>>, vector<1x4x8xf32>
    %8 = vector.shape_cast %7 : vector<1x4x8xf32> to vector<4x8xf32>
    %cst_6 = arith.constant dense<0.000000e+00> : vector<4x4xf32>
    %9 = tpu.matmul %6, %8, %cst_6 {dimension_numbers = #tpu.dot_dimension_numbers<[1], [1], [0], [0], [0, 0, 1, 0], [], []>} : vector<4x8xf32>, vector<4x8xf32>, vector<4x4xf32> -> vector<4x4xf32>
    %c0_7 = arith.constant 0 : index
    %c0_8 = arith.constant 0 : index
    %10 = vector.load %arg7[%c0_7, %c0_8] : memref<4x1xf32, #tpu.memory_space<vmem>>, vector<4x1xf32>
    %cst_9 = arith.constant dense<0xFF800000> : vector<4xf32>
    %11 = vector.multi_reduction <maximumf>, %9, %cst_9 [1] : vector<4x4xf32> to vector<4xf32>
    %12 = vector.shape_cast %11 : vector<4xf32> to vector<4x1xf32>
    %13 = arith.maximumf %10, %12 : vector<4x1xf32>
    %c0_10 = arith.constant 0 : index
    %c0_11 = arith.constant 0 : index
    %14 = vector.load %arg7[%c0_10, %c0_11] : memref<4x1xf32, #tpu.memory_space<vmem>>, vector<4x1xf32>
    %15 = arith.subf %14, %13 : vector<4x1xf32>
    %16 = math.exp %15 : vector<4x1xf32>
    %17 = vector.broadcast %13 : vector<4x1xf32> to vector<4x4xf32>
    %18 = arith.subf %9, %17 : vector<4x4xf32>
    %19 = math.exp %18 : vector<4x4xf32>
    %c0_12 = arith.constant 0 : index
    %c0_13 = arith.constant 0 : index
    %20 = vector.load %arg8[%c0_12, %c0_13] : memref<4x1xf32, #tpu.memory_space<vmem>>, vector<4x1xf32>
    %21 = arith.mulf %16, %20 : vector<4x1xf32>
    %cst_14 = arith.constant dense<0.000000e+00> : vector<4xf32>
    %22 = vector.multi_reduction <add>, %19, %cst_14 [1] : vector<4x4xf32> to vector<4xf32>
    %23 = vector.shape_cast %22 : vector<4xf32> to vector<4x1xf32>
    %24 = arith.addf %21, %23 : vector<4x1xf32>
    %c0_15 = arith.constant 0 : index
    %c0_16 = arith.constant 0 : index
    %25 = vector.load %arg8[%c0_15, %c0_16] : memref<4x1xf32, #tpu.memory_space<vmem>>, vector<4x1xf32>
    tpu.vector_store %arg8[%c0_15, %c0_16], %24 {strides = array<i32>} : memref<4x1xf32, #tpu.memory_space<vmem>>, vector<4x1xf32>,
    %c0_17 = arith.constant 0 : index
    %c0_18 = arith.constant 0 : index
    %26 = vector.load %arg9[%c0_17, %c0_18] : memref<4x8xf32, #tpu.memory_space<vmem>>, vector<4x8xf32>
    %27 = vector.broadcast %16 : vector<4x1xf32> to vector<4x8xf32>
    %28 = arith.mulf %27, %26 : vector<4x8xf32>
    %c0_19 = arith.constant 0 : index
    %c0_20 = arith.constant 0 : index
    %c0_21 = arith.constant 0 : index
    %29 = vector.load %arg5[%c0_19, %c0_20, %c0_21] : memref<1x4x8xf32, #tpu.memory_space<vmem>>, vector<1x4x8xf32>
    %30 = vector.shape_cast %29 : vector<1x4x8xf32> to vector<4x8xf32>
    %cst_22 = arith.constant dense<0.000000e+00> : vector<4x8xf32>
    %31 = tpu.matmul %19, %30, %cst_22 {dimension_numbers = #tpu.dot_dimension_numbers<[1], [0], [0], [1], [0, 0, 1, 1], [], []>} : vector<4x4xf32>, vector<4x8xf32>, vector<4x8xf32> -> vector<4x8xf32>
    %32 = arith.addf %28, %31 : vector<4x8xf32>
    %c0_23 = arith.constant 0 : index
    %c0_24 = arith.constant 0 : index
    %33 = vector.load %arg9[%c0_23, %c0_24] : memref<4x8xf32, #tpu.memory_space<vmem>>, vector<4x8xf32>
    tpu.vector_store %arg9[%c0_23, %c0_24], %32 {strides = array<i32>} : memref<4x8xf32, #tpu.memory_space<vmem>>, vector<4x8xf32>,
    %c0_25 = arith.constant 0 : index
    %c0_26 = arith.constant 0 : index
    %34 = vector.load %arg7[%c0_25, %c0_26] : memref<4x1xf32, #tpu.memory_space<vmem>>, vector<4x1xf32>
    tpu.vector_store %arg7[%c0_25, %c0_26], %13 {strides = array<i32>} : memref<4x1xf32, #tpu.memory_space<vmem>>, vector<4x1xf32>,
    %c0_i32_27 = arith.constant 0 : i32
    %35 = arith.cmpi eq, %arg2, %c0_i32_27 : i32
    %36 = arith.extui %35 : i1 to i32
    %c0_i32_28 = arith.constant 0 : i32
    %37 = arith.cmpi ne, %36, %c0_i32_28 : i32
    scf.if %37 {
      %c0_29 = arith.constant 0 : index
      %c0_30 = arith.constant 0 : index
      %38 = vector.load %arg9[%c0_29, %c0_30] : memref<4x8xf32, #tpu.memory_space<vmem>>, vector<4x8xf32>
      %c0_31 = arith.constant 0 : index
      %c0_32 = arith.constant 0 : index
      %39 = vector.load %arg8[%c0_31, %c0_32] : memref<4x1xf32, #tpu.memory_space<vmem>>, vector<4x1xf32>
      %40 = tpu.reciprocal %39 {approx = true} : vector<4x1xf32> -> vector<4x1xf32>
      %41 = vector.broadcast %40 : vector<4x1xf32> to vector<4x8xf32>
      %42 = arith.mulf %38, %41 : vector<4x8xf32>
      %c0_33 = arith.constant 0 : index
      %c0_34 = arith.constant 0 : index
      %c0_35 = arith.constant 0 : index
      %43 = vector.load %arg6[%c0_33, %c0_34, %c0_35] : memref<1x4x8xf32, #tpu.memory_space<vmem>>, vector<1x4x8xf32>
      %44 = vector.shape_cast %43 : vector<1x4x8xf32> to vector<4x8xf32>
      %45 = vector.shape_cast %42 : vector<4x8xf32> to vector<1x4x8xf32>
      tpu.vector_store %arg6[%c0_33, %c0_34, %c0_35], %45 {strides = array<i32>} : memref<1x4x8xf32, #tpu.memory_space<vmem>>, vector<1x4x8xf32>,
    } else {
    }
    return
  }
  func.func @transform_0(%arg0: i32, %arg1: i32, %arg2: i32) -> (i32, i32, i32) {
    %c0_i32 = arith.constant 0 : i32
    %c0_i32_0 = arith.constant 0 : i32
    return %arg0, %arg1, %c0_i32 : i32, i32, i32
  }
  func.func @transform_1(%arg0: i32, %arg1: i32, %arg2: i32) -> (i32, i32, i32) {
    %c0_i32 = arith.constant 0 : i32
    %c0_i32_0 = arith.constant 0 : i32
    return %arg0, %arg2, %c0_i32 : i32, i32, i32
  }
  func.func @transform_2(%arg0: i32, %arg1: i32, %arg2: i32) -> (i32, i32, i32) {
    %c0_i32 = arith.constant 0 : i32
    %c0_i32_0 = arith.constant 0 : i32
    return %arg0, %arg2, %c0_i32 : i32, i32, i32
  }
  func.func @transform_3(%arg0: i32, %arg1: i32, %arg2: i32) -> (i32, i32, i32) {
    %c0_i32 = arith.constant 0 : i32
    %c0_i32_0 = arith.constant 0 : i32
    return %arg0, %arg1, %c0_i32 : i32, i32, i32
  }
}

module attributes {stable_mosaic.version = 11 : i64} {
  func.func @_ln_mlp_res_kernel(%arg0: i32, %arg1: memref<8x32xf32, #tpu.memory_space<vmem>>, %arg2: memref<1x32xf32, #tpu.memory_space<vmem>>, %arg3: memref<1x32xf32, #tpu.memory_space<vmem>>, %arg4: memref<32x128xf32, #tpu.memory_space<vmem>>, %arg5: memref<1x128xf32, #tpu.memory_space<vmem>>, %arg6: memref<128x32xf32, #tpu.memory_space<vmem>>, %arg7: memref<1x32xf32, #tpu.memory_space<vmem>>, %arg8: memref<8x32xf32, #tpu.memory_space<vmem>>) attributes {dimension_semantics = [#tpu.dimension_semantics<parallel>], iteration_bounds = array<i64: 1>, scalar_prefetch = 0 : i64, scratch_operands = 0 : i64, tpu.core_type = #tpu.core_type<tc>, window_params = [{transform_indices = @transform_0, window_bounds = array<i64: 8, 32>}, {pipeline_mode = #tpu.pipeline_mode<synchronous>, transform_indices = @transform_1, window_bounds = array<i64: 1, 32>}, {pipeline_mode = #tpu.pipeline_mode<synchronous>, transform_indices = @transform_2, window_bounds = array<i64: 1, 32>}, {pipeline_mode = #tpu.pipeline_mode<synchronous>, transform_indices = @transform_3, window_bounds = array<i64: 32, 128>}, {pipeline_mode = #tpu.pipeline_mode<synchronous>, transform_indices = @transform_4, window_bounds = array<i64: 1, 128>}, {pipeline_mode = #tpu.pipeline_mode<synchronous>, transform_indices = @transform_5, window_bounds = array<i64: 128, 32>}, {pipeline_mode = #tpu.pipeline_mode<synchronous>, transform_indices = @transform_6, window_bounds = array<i64: 1, 32>}, {transform_indices = @transform_7, window_bounds = array<i64: 8, 32>}]} {
    %c0 = arith.constant 0 : index
    %c0_0 = arith.constant 0 : index
    %0 = vector.load %arg1[%c0, %c0_0] : memref<8x32xf32, #tpu.memory_space<vmem>>, vector<8x32xf32>
    %cst = arith.constant dense<0.000000e+00> : vector<8xf32>
    %1 = vector.multi_reduction <add>, %0, %cst [1] : vector<8x32xf32> to vector<8xf32>
    %2 = vector.shape_cast %1 : vector<8xf32> to vector<8x1xf32>
    %cst_1 = arith.constant 3.200000e+01 : f32
    %3 = vector.broadcast %cst_1 : f32 to vector<8x1xf32>
    %4 = arith.divf %2, %3 : vector<8x1xf32>
    %5 = vector.broadcast %4 : vector<8x1xf32> to vector<8x32xf32>
    %6 = arith.subf %0, %5 : vector<8x32xf32>
    %7 = arith.mulf %6, %6 : vector<8x32xf32>
    %cst_2 = arith.constant dense<0.000000e+00> : vector<8xf32>
    %8 = vector.multi_reduction <add>, %7, %cst_2 [1] : vector<8x32xf32> to vector<8xf32>
    %9 = vector.shape_cast %8 : vector<8xf32> to vector<8x1xf32>
    %cst_3 = arith.constant 3.200000e+01 : f32
    %10 = vector.broadcast %cst_3 : f32 to vector<8x1xf32>
    %11 = arith.divf %9, %10 : vector<8x1xf32>
    %12 = vector.broadcast %4 : vector<8x1xf32> to vector<8x32xf32>
    %13 = arith.subf %0, %12 : vector<8x32xf32>
    %cst_4 = arith.constant 9.99999997E-7 : f32
    %14 = vector.broadcast %cst_4 : f32 to vector<8x1xf32>
    %15 = arith.addf %11, %14 : vector<8x1xf32>
    %16 = math.rsqrt %15 : vector<8x1xf32>
    %17 = vector.broadcast %16 : vector<8x1xf32> to vector<8x32xf32>
    %18 = arith.mulf %13, %17 : vector<8x32xf32>
    %c0_5 = arith.constant 0 : index
    %c0_6 = arith.constant 0 : index
    %19 = vector.load %arg2[%c0_5, %c0_6] : memref<1x32xf32, #tpu.memory_space<vmem>>, vector<1x32xf32>
    %20 = vector.broadcast %19 : vector<1x32xf32> to vector<8x32xf32>
    %21 = arith.mulf %18, %20 : vector<8x32xf32>
    %c0_7 = arith.constant 0 : index
    %c0_8 = arith.constant 0 : index
    %22 = vector.load %arg3[%c0_7, %c0_8] : memref<1x32xf32, #tpu.memory_space<vmem>>, vector<1x32xf32>
    %23 = vector.broadcast %22 : vector<1x32xf32> to vector<8x32xf32>
    %24 = arith.addf %21, %23 : vector<8x32xf32>
    %c0_9 = arith.constant 0 : index
    %c0_10 = arith.constant 0 : index
    %25 = vector.load %arg4[%c0_9, %c0_10] : memref<32x128xf32, #tpu.memory_space<vmem>>, vector<32x128xf32>
    %cst_11 = arith.constant dense<0.000000e+00> : vector<8x128xf32>
    %26 = tpu.matmul %24, %25, %cst_11 {dimension_numbers = #tpu.dot_dimension_numbers<[1], [0], [0], [1], [0, 0, 1, 1], [], []>} : vector<8x32xf32>, vector<32x128xf32>, vector<8x128xf32> -> vector<8x128xf32>
    %c0_12 = arith.constant 0 : index
    %c0_13 = arith.constant 0 : index
    %27 = vector.load %arg5[%c0_12, %c0_13] : memref<1x128xf32, #tpu.memory_space<vmem>>, vector<1x128xf32>
    %28 = vector.broadcast %27 : vector<1x128xf32> to vector<8x128xf32>
    %29 = arith.addf %26, %28 : vector<8x128xf32>
    %30 = arith.mulf %29, %29 : vector<8x128xf32>
    %31 = arith.mulf %29, %30 : vector<8x128xf32>
    %cst_14 = arith.constant 4.471500e-02 : f32
    %32 = vector.broadcast %cst_14 : f32 to vector<8x128xf32>
    %33 = arith.mulf %32, %31 : vector<8x128xf32>
    %34 = arith.addf %29, %33 : vector<8x128xf32>
    %cst_15 = arith.constant 0.797884583 : f32
    %35 = vector.broadcast %cst_15 : f32 to vector<8x128xf32>
    %36 = arith.mulf %35, %34 : vector<8x128xf32>
    %37 = math.tanh %36 : vector<8x128xf32>
    %cst_16 = arith.constant 1.000000e+00 : f32
    %38 = vector.broadcast %cst_16 : f32 to vector<8x128xf32>
    %39 = arith.addf %38, %37 : vector<8x128xf32>
    %cst_17 = arith.constant 5.000000e-01 : f32
    %40 = vector.broadcast %cst_17 : f32 to vector<8x128xf32>
    %41 = arith.mulf %40, %39 : vector<8x128xf32>
    %42 = arith.mulf %29, %41 : vector<8x128xf32>
    %c0_18 = arith.constant 0 : index
    %c0_19 = arith.constant 0 : index
    %43 = vector.load %arg6[%c0_18, %c0_19] : memref<128x32xf32, #tpu.memory_space<vmem>>, vector<128x32xf32>
    %cst_20 = arith.constant dense<0.000000e+00> : vector<8x32xf32>
    %44 = tpu.matmul %42, %43, %cst_20 {dimension_numbers = #tpu.dot_dimension_numbers<[1], [0], [0], [1], [0, 0, 1, 1], [], []>} : vector<8x128xf32>, vector<128x32xf32>, vector<8x32xf32> -> vector<8x32xf32>
    %c0_21 = arith.constant 0 : index
    %c0_22 = arith.constant 0 : index
    %45 = vector.load %arg7[%c0_21, %c0_22] : memref<1x32xf32, #tpu.memory_space<vmem>>, vector<1x32xf32>
    %46 = vector.broadcast %45 : vector<1x32xf32> to vector<8x32xf32>
    %47 = arith.addf %44, %46 : vector<8x32xf32>
    %48 = arith.addf %47, %0 : vector<8x32xf32>
    %c0_23 = arith.constant 0 : index
    %c0_24 = arith.constant 0 : index
    %49 = vector.load %arg8[%c0_23, %c0_24] : memref<8x32xf32, #tpu.memory_space<vmem>>, vector<8x32xf32>
    tpu.vector_store %arg8[%c0_23, %c0_24], %48 {strides = array<i32>} : memref<8x32xf32, #tpu.memory_space<vmem>>, vector<8x32xf32>,
    return
  }
  func.func @transform_0(%arg0: i32) -> (i32, i32) {
    %c0_i32 = arith.constant 0 : i32
    %c0_i32_0 = arith.constant 0 : i32
    return %arg0, %c0_i32 : i32, i32
  }
  func.func @transform_1(%arg0: i32) -> (i32, i32) {
    %c0_i32 = arith.constant 0 : i32
    %c0_i32_0 = arith.constant 0 : i32
    %c0_i32_1 = arith.constant 0 : i32
    return %c0_i32, %c0_i32_0 : i32, i32
  }
  func.func @transform_2(%arg0: i32) -> (i32, i32) {
    %c0_i32 = arith.constant 0 : i32
    %c0_i32_0 = arith.constant 0 : i32
    %c0_i32_1 = arith.constant 0 : i32
    return %c0_i32, %c0_i32_0 : i32, i32
  }
  func.func @transform_3(%arg0: i32) -> (i32, i32) {
    %c0_i32 = arith.constant 0 : i32
    %c0_i32_0 = arith.constant 0 : i32
    %c0_i32_1 = arith.constant 0 : i32
    return %c0_i32, %c0_i32_0 : i32, i32
  }
  func.func @transform_4(%arg0: i32) -> (i32, i32) {
    %c0_i32 = arith.constant 0 : i32
    %c0_i32_0 = arith.constant 0 : i32
    %c0_i32_1 = arith.constant 0 : i32
    return %c0_i32, %c0_i32_0 : i32, i32
  }
  func.func @transform_5(%arg0: i32) -> (i32, i32) {
    %c0_i32 = arith.constant 0 : i32
    %c0_i32_0 = arith.constant 0 : i32
    %c0_i32_1 = arith.constant 0 : i32
    return %c0_i32, %c0_i32_0 : i32, i32
  }
  func.func @transform_6(%arg0: i32) -> (i32, i32) {
    %c0_i32 = arith.constant 0 : i32
    %c0_i32_0 = arith.constant 0 : i32
    %c0_i32_1 = arith.constant 0 : i32
    return %c0_i32, %c0_i32_0 : i32, i32
  }
  func.func @transform_7(%arg0: i32) -> (i32, i32) {
    %c0_i32 = arith.constant 0 : i32
    %c0_i32_0 = arith.constant 0 : i32
    return %arg0, %c0_i32 : i32, i32
  }
}

module attributes {stable_mosaic.version = 11 : i64} {
  func.func @_matmul_ln_kernel(%arg0: i32, %arg1: memref<8x32xf32, #tpu.memory_space<vmem>>, %arg2: memref<32x32xf32, #tpu.memory_space<vmem>>, %arg3: memref<1x32xf32, #tpu.memory_space<vmem>>, %arg4: memref<1x32xf32, #tpu.memory_space<vmem>>, %arg5: memref<8x32xf32, #tpu.memory_space<vmem>>) attributes {dimension_semantics = [#tpu.dimension_semantics<parallel>], iteration_bounds = array<i64: 1>, scalar_prefetch = 0 : i64, scratch_operands = 0 : i64, tpu.core_type = #tpu.core_type<tc>, window_params = [{transform_indices = @transform_0, window_bounds = array<i64: 8, 32>}, {pipeline_mode = #tpu.pipeline_mode<synchronous>, transform_indices = @transform_1, window_bounds = array<i64: 32, 32>}, {pipeline_mode = #tpu.pipeline_mode<synchronous>, transform_indices = @transform_2, window_bounds = array<i64: 1, 32>}, {pipeline_mode = #tpu.pipeline_mode<synchronous>, transform_indices = @transform_3, window_bounds = array<i64: 1, 32>}, {transform_indices = @transform_4, window_bounds = array<i64: 8, 32>}]} {
    %c0 = arith.constant 0 : index
    %c0_0 = arith.constant 0 : index
    %0 = vector.load %arg1[%c0, %c0_0] : memref<8x32xf32, #tpu.memory_space<vmem>>, vector<8x32xf32>
    %c0_1 = arith.constant 0 : index
    %c0_2 = arith.constant 0 : index
    %1 = vector.load %arg2[%c0_1, %c0_2] : memref<32x32xf32, #tpu.memory_space<vmem>>, vector<32x32xf32>
    %cst = arith.constant dense<0.000000e+00> : vector<8x32xf32>
    %2 = tpu.matmul %0, %1, %cst {dimension_numbers = #tpu.dot_dimension_numbers<[1], [0], [0], [1], [0, 0, 1, 1], [], []>} : vector<8x32xf32>, vector<32x32xf32>, vector<8x32xf32> -> vector<8x32xf32>
    %cst_3 = arith.constant dense<0.000000e+00> : vector<8xf32>
    %3 = vector.multi_reduction <add>, %2, %cst_3 [1] : vector<8x32xf32> to vector<8xf32>
    %4 = vector.shape_cast %3 : vector<8xf32> to vector<8x1xf32>
    %cst_4 = arith.constant 3.200000e+01 : f32
    %5 = vector.broadcast %cst_4 : f32 to vector<8x1xf32>
    %6 = arith.divf %4, %5 : vector<8x1xf32>
    %7 = vector.broadcast %6 : vector<8x1xf32> to vector<8x32xf32>
    %8 = arith.subf %2, %7 : vector<8x32xf32>
    %9 = arith.mulf %8, %8 : vector<8x32xf32>
    %cst_5 = arith.constant dense<0.000000e+00> : vector<8xf32>
    %10 = vector.multi_reduction <add>, %9, %cst_5 [1] : vector<8x32xf32> to vector<8xf32>
    %11 = vector.shape_cast %10 : vector<8xf32> to vector<8x1xf32>
    %cst_6 = arith.constant 3.200000e+01 : f32
    %12 = vector.broadcast %cst_6 : f32 to vector<8x1xf32>
    %13 = arith.divf %11, %12 : vector<8x1xf32>
    %14 = vector.broadcast %6 : vector<8x1xf32> to vector<8x32xf32>
    %15 = arith.subf %2, %14 : vector<8x32xf32>
    %cst_7 = arith.constant 9.99999997E-7 : f32
    %16 = vector.broadcast %cst_7 : f32 to vector<8x1xf32>
    %17 = arith.addf %13, %16 : vector<8x1xf32>
    %18 = math.rsqrt %17 : vector<8x1xf32>
    %19 = vector.broadcast %18 : vector<8x1xf32> to vector<8x32xf32>
    %20 = arith.mulf %15, %19 : vector<8x32xf32>
    %c0_8 = arith.constant 0 : index
    %c0_9 = arith.constant 0 : index
    %21 = vector.load %arg3[%c0_8, %c0_9] : memref<1x32xf32, #tpu.memory_space<vmem>>, vector<1x32xf32>
    %22 = vector.broadcast %21 : vector<1x32xf32> to vector<8x32xf32>
    %23 = arith.mulf %20, %22 : vector<8x32xf32>
    %c0_10 = arith.constant 0 : index
    %c0_11 = arith.constant 0 : index
    %24 = vector.load %arg4[%c0_10, %c0_11] : memref<1x32xf32, #tpu.memory_space<vmem>>, vector<1x32xf32>
    %25 = vector.broadcast %24 : vector<1x32xf32> to vector<8x32xf32>
    %26 = arith.addf %23, %25 : vector<8x32xf32>
    %c0_12 = arith.constant 0 : index
    %c0_13 = arith.constant 0 : index
    %27 = vector.load %arg5[%c0_12, %c0_13] : memref<8x32xf32, #tpu.memory_space<vmem>>, vector<8x32xf32>
    tpu.vector_store %arg5[%c0_12, %c0_13], %26 {strides = array<i32>} : memref<8x32xf32, #tpu.memory_space<vmem>>, vector<8x32xf32>,
    return
  }
  func.func @transform_0(%arg0: i32) -> (i32, i32) {
    %c0_i32 = arith.constant 0 : i32
    %c0_i32_0 = arith.constant 0 : i32
    return %arg0, %c0_i32 : i32, i32
  }
  func.func @transform_1(%arg0: i32) -> (i32, i32) {
    %c0_i32 = arith.constant 0 : i32
    %c0_i32_0 = arith.constant 0 : i32
    %c0_i32_1 = arith.constant 0 : i32
    return %c0_i32, %c0_i32_0 : i32, i32
  }
  func.func @transform_2(%arg0: i32) -> (i32, i32) {
    %c0_i32 = arith.constant 0 : i32
    %c0_i32_0 = arith.constant 0 : i32
    %c0_i32_1 = arith.constant 0 : i32
    return %c0_i32, %c0_i32_0 : i32, i32
  }
  func.func @transform_3(%arg0: i32) -> (i32, i32) {
    %c0_i32 = arith.constant 0 : i32
    %c0_i32_0 = arith.constant 0 : i32
    %c0_i32_1 = arith.constant 0 : i32
    return %c0_i32, %c0_i32_0 : i32, i32
  }
  func.func @transform_4(%arg0: i32) -> (i32, i32) {
    %c0_i32 = arith.constant 0 : i32
    %c0_i32_0 = arith.constant 0 : i32
    return %arg0, %c0_i32 : i32, i32
  }
}

module attributes {stable_mosaic.version = 11 : i64} {
  func.func @_conv3x3_ln_kernel(%arg0: i32, %arg1: i32, %arg2: memref<1x4x4x32xf32, #tpu.memory_space<vmem>>, %arg3: memref<9x32x32xf32, #tpu.memory_space<vmem>>, %arg4: memref<1x32xf32, #tpu.memory_space<vmem>>, %arg5: memref<1x32xf32, #tpu.memory_space<vmem>>, %arg6: memref<1x1x2x32xf32, #tpu.memory_space<vmem>>) attributes {dimension_semantics = [#tpu.dimension_semantics<parallel>, #tpu.dimension_semantics<arbitrary>], iteration_bounds = array<i64: 2, 2>, scalar_prefetch = 0 : i64, scratch_operands = 0 : i64, tpu.core_type = #tpu.core_type<tc>, window_params = [{transform_indices = @transform_0, window_bounds = array<i64: 1, 4, 4, 32>}, {pipeline_mode = #tpu.pipeline_mode<synchronous>, transform_indices = @transform_1, window_bounds = array<i64: 9, 32, 32>}, {pipeline_mode = #tpu.pipeline_mode<synchronous>, transform_indices = @transform_2, window_bounds = array<i64: 1, 32>}, {pipeline_mode = #tpu.pipeline_mode<synchronous>, transform_indices = @transform_3, window_bounds = array<i64: 1, 32>}, {transform_indices = @transform_4, window_bounds = array<i64: 1, 1, 2, 32>}]} {
    %cst = arith.constant 0.000000e+00 : f32
    %0 = vector.broadcast %cst : f32 to vector<2x32xf32>
    %c0_i32 = arith.constant 0 : i32
    %1 = arith.addi %arg1, %c0_i32 : i32
    %c0 = arith.constant 0 : index
    %2 = arith.index_cast %1 : i32 to index
    %c0_0 = arith.constant 0 : index
    %c0_1 = arith.constant 0 : index
    %3 = vector.load %arg2[%c0, %2, %c0_0, %c0_1] : memref<1x4x4x32xf32, #tpu.memory_space<vmem>>, vector<1x1x2x32xf32>
    %4 = vector.shape_cast %3 : vector<1x1x2x32xf32> to vector<2x32xf32>
    %c0_2 = arith.constant 0 : index
    %c0_3 = arith.constant 0 : index
    %c0_4 = arith.constant 0 : index
    %5 = vector.load %arg3[%c0_2, %c0_3, %c0_4] : memref<9x32x32xf32, #tpu.memory_space<vmem>>, vector<1x32x32xf32>
    %6 = vector.shape_cast %5 : vector<1x32x32xf32> to vector<32x32xf32>
    %cst_5 = arith.constant dense<0.000000e+00> : vector<2x32xf32>
    %7 = tpu.matmul %4, %6, %cst_5 {dimension_numbers = #tpu.dot_dimension_numbers<[1], [0], [0], [1], [0, 0, 1, 1], [], []>} : vector<2x32xf32>, vector<32x32xf32>, vector<2x32xf32> -> vector<2x32xf32>
    %8 = arith.addf %0, %7 : vector<2x32xf32>
    %c0_i32_6 = arith.constant 0 : i32
    %9 = arith.addi %arg1, %c0_i32_6 : i32
    %c0_7 = arith.constant 0 : index
    %10 = arith.index_cast %9 : i32 to index
    %c1 = arith.constant 1 : index
    %c0_8 = arith.constant 0 : index
    %11 = vector.load %arg2[%c0_7, %10, %c1, %c0_8] : memref<1x4x4x32xf32, #tpu.memory_space<vmem>>, vector<1x1x2x32xf32>
    %12 = vector.shape_cast %11 : vector<1x1x2x32xf32> to vector<2x32xf32>
    %c1_9 = arith.constant 1 : index
    %c0_10 = arith.constant 0 : index
    %c0_11 = arith.constant 0 : index
    %13 = vector.load %arg3[%c1_9, %c0_10, %c0_11] : memref<9x32x32xf32, #tpu.memory_space<vmem>>, vector<1x32x32xf32>
    %14 = vector.shape_cast %13 : vector<1x32x32xf32> to vector<32x32xf32>
    %cst_12 = arith.constant dense<0.000000e+00> : vector<2x32xf32>
    %15 = tpu.matmul %12, %14, %cst_12 {dimension_numbers = #tpu.dot_dimension_numbers<[1], [0], [0], [1], [0, 0, 1, 1], [], []>} : vector<2x32xf32>, vector<32x32xf32>, vector<2x32xf32> -> vector<2x32xf32>
    %16 = arith.addf %8, %15 : vector<2x32xf32>
    %c0_i32_13 = arith.constant 0 : i32
    %17 = arith.addi %arg1, %c0_i32_13 : i32
    %c0_14 = arith.constant 0 : index
    %18 = arith.index_cast %17 : i32 to index
    %c2 = arith.constant 2 : index
    %c0_15 = arith.constant 0 : index
    %19 = vector.load %arg2[%c0_14, %18, %c2, %c0_15] : memref<1x4x4x32xf32, #tpu.memory_space<vmem>>, vector<1x1x2x32xf32>
    %20 = vector.shape_cast %19 : vector<1x1x2x32xf32> to vector<2x32xf32>
    %c2_16 = arith.constant 2 : index
    %c0_17 = arith.constant 0 : index
    %c0_18 = arith.constant 0 : index
    %21 = vector.load %arg3[%c2_16, %c0_17, %c0_18] : memref<9x32x32xf32, #tpu.memory_space<vmem>>, vector<1x32x32xf32>
    %22 = vector.shape_cast %21 : vector<1x32x32xf32> to vector<32x32xf32>
    %cst_19 = arith.constant dense<0.000000e+00> : vector<2x32xf32>
    %23 = tpu.matmul %20, %22, %cst_19 {dimension_numbers = #tpu.dot_dimension_numbers<[1], [0], [0], [1], [0, 0, 1, 1], [], []>} : vector<2x32xf32>, vector<32x32xf32>, vector<2x32xf32> -> vector<2x32xf32>
    %24 = arith.addf %16, %23 : vector<2x32xf32>
    %c1_i32 = arith.constant 1 : i32
    %25 = arith.addi %arg1, %c1_i32 : i32
    %c0_20 = arith.constant 0 : index
    %26 = arith.index_cast %25 : i32 to index
    %c0_21 = arith.constant 0 : index
    %c0_22 = arith.constant 0 : index
    %27 = vector.load %arg2[%c0_20, %26, %c0_21, %c0_22] : memref<1x4x4x32xf32, #tpu.memory_space<vmem>>, vector<1x1x2x32xf32>
    %28 = vector.shape_cast %27 : vector<1x1x2x32xf32> to vector<2x32xf32>
    %c3 = arith.constant 3 : index
    %c0_23 = arith.constant 0 : index
    %c0_24 = arith.constant 0 : index
    %29 = vector.load %arg3[%c3, %c0_23, %c0_24] : memref<9x32x32xf32, #tpu.memory_space<vmem>>, vector<1x32x32xf32>
    %30 = vector.shape_cast %29 : vector<1x32x32xf32> to vector<32x32xf32>
    %cst_25 = arith.constant dense<0.000000e+00> : vector<2x32xf32>
    %31 = tpu.matmul %28, %30, %cst_25 {dimension_numbers = #tpu.dot_dimension_numbers<[1], [0], [0], [1], [0, 0, 1, 1], [], []>} : vector<2x32xf32>, vector<32x32xf32>, vector<2x32xf32> -> vector<2x32xf32>
    %32 = arith.addf %24, %31 : vector<2x32xf32>
    %c1_i32_26 = arith.constant 1 : i32
    %33 = arith.addi %arg1, %c1_i32_26 : i32
    %c0_27 = arith.constant 0 : index
    %34 = arith.index_cast %33 : i32 to index
    %c1_28 = arith.constant 1 : index
    %c0_29 = arith.constant 0 : index
    %35 = vector.load %arg2[%c0_27, %34, %c1_28, %c0_29] : memref<1x4x4x32xf32, #tpu.memory_space<vmem>>, vector<1x1x2x32xf32>
    %36 = vector.shape_cast %35 : vector<1x1x2x32xf32> to vector<2x32xf32>
    %c4 = arith.constant 4 : index
    %c0_30 = arith.constant 0 : index
    %c0_31 = arith.constant 0 : index
    %37 = vector.load %arg3[%c4, %c0_30, %c0_31] : memref<9x32x32xf32, #tpu.memory_space<vmem>>, vector<1x32x32xf32>
    %38 = vector.shape_cast %37 : vector<1x32x32xf32> to vector<32x32xf32>
    %cst_32 = arith.constant dense<0.000000e+00> : vector<2x32xf32>
    %39 = tpu.matmul %36, %38, %cst_32 {dimension_numbers = #tpu.dot_dimension_numbers<[1], [0], [0], [1], [0, 0, 1, 1], [], []>} : vector<2x32xf32>, vector<32x32xf32>, vector<2x32xf32> -> vector<2x32xf32>
    %40 = arith.addf %32, %39 : vector<2x32xf32>
    %c1_i32_33 = arith.constant 1 : i32
    %41 = arith.addi %arg1, %c1_i32_33 : i32
    %c0_34 = arith.constant 0 : index
    %42 = arith.index_cast %41 : i32 to index
    %c2_35 = arith.constant 2 : index
    %c0_36 = arith.constant 0 : index
    %43 = vector.load %arg2[%c0_34, %42, %c2_35, %c0_36] : memref<1x4x4x32xf32, #tpu.memory_space<vmem>>, vector<1x1x2x32xf32>
    %44 = vector.shape_cast %43 : vector<1x1x2x32xf32> to vector<2x32xf32>
    %c5 = arith.constant 5 : index
    %c0_37 = arith.constant 0 : index
    %c0_38 = arith.constant 0 : index
    %45 = vector.load %arg3[%c5, %c0_37, %c0_38] : memref<9x32x32xf32, #tpu.memory_space<vmem>>, vector<1x32x32xf32>
    %46 = vector.shape_cast %45 : vector<1x32x32xf32> to vector<32x32xf32>
    %cst_39 = arith.constant dense<0.000000e+00> : vector<2x32xf32>
    %47 = tpu.matmul %44, %46, %cst_39 {dimension_numbers = #tpu.dot_dimension_numbers<[1], [0], [0], [1], [0, 0, 1, 1], [], []>} : vector<2x32xf32>, vector<32x32xf32>, vector<2x32xf32> -> vector<2x32xf32>
    %48 = arith.addf %40, %47 : vector<2x32xf32>
    %c2_i32 = arith.constant 2 : i32
    %49 = arith.addi %arg1, %c2_i32 : i32
    %c0_40 = arith.constant 0 : index
    %50 = arith.index_cast %49 : i32 to index
    %c0_41 = arith.constant 0 : index
    %c0_42 = arith.constant 0 : index
    %51 = vector.load %arg2[%c0_40, %50, %c0_41, %c0_42] : memref<1x4x4x32xf32, #tpu.memory_space<vmem>>, vector<1x1x2x32xf32>
    %52 = vector.shape_cast %51 : vector<1x1x2x32xf32> to vector<2x32xf32>
    %c6 = arith.constant 6 : index
    %c0_43 = arith.constant 0 : index
    %c0_44 = arith.constant 0 : index
    %53 = vector.load %arg3[%c6, %c0_43, %c0_44] : memref<9x32x32xf32, #tpu.memory_space<vmem>>, vector<1x32x32xf32>
    %54 = vector.shape_cast %53 : vector<1x32x32xf32> to vector<32x32xf32>
    %cst_45 = arith.constant dense<0.000000e+00> : vector<2x32xf32>
    %55 = tpu.matmul %52, %54, %cst_45 {dimension_numbers = #tpu.dot_dimension_numbers<[1], [0], [0], [1], [0, 0, 1, 1], [], []>} : vector<2x32xf32>, vector<32x32xf32>, vector<2x32xf32> -> vector<2x32xf32>
    %56 = arith.addf %48, %55 : vector<2x32xf32>
    %c2_i32_46 = arith.constant 2 : i32
    %57 = arith.addi %arg1, %c2_i32_46 : i32
    %c0_47 = arith.constant 0 : index
    %58 = arith.index_cast %57 : i32 to index
    %c1_48 = arith.constant 1 : index
    %c0_49 = arith.constant 0 : index
    %59 = vector.load %arg2[%c0_47, %58, %c1_48, %c0_49] : memref<1x4x4x32xf32, #tpu.memory_space<vmem>>, vector<1x1x2x32xf32>
    %60 = vector.shape_cast %59 : vector<1x1x2x32xf32> to vector<2x32xf32>
    %c7 = arith.constant 7 : index
    %c0_50 = arith.constant 0 : index
    %c0_51 = arith.constant 0 : index
    %61 = vector.load %arg3[%c7, %c0_50, %c0_51] : memref<9x32x32xf32, #tpu.memory_space<vmem>>, vector<1x32x32xf32>
    %62 = vector.shape_cast %61 : vector<1x32x32xf32> to vector<32x32xf32>
    %cst_52 = arith.constant dense<0.000000e+00> : vector<2x32xf32>
    %63 = tpu.matmul %60, %62, %cst_52 {dimension_numbers = #tpu.dot_dimension_numbers<[1], [0], [0], [1], [0, 0, 1, 1], [], []>} : vector<2x32xf32>, vector<32x32xf32>, vector<2x32xf32> -> vector<2x32xf32>
    %64 = arith.addf %56, %63 : vector<2x32xf32>
    %c2_i32_53 = arith.constant 2 : i32
    %65 = arith.addi %arg1, %c2_i32_53 : i32
    %c0_54 = arith.constant 0 : index
    %66 = arith.index_cast %65 : i32 to index
    %c2_55 = arith.constant 2 : index
    %c0_56 = arith.constant 0 : index
    %67 = vector.load %arg2[%c0_54, %66, %c2_55, %c0_56] : memref<1x4x4x32xf32, #tpu.memory_space<vmem>>, vector<1x1x2x32xf32>
    %68 = vector.shape_cast %67 : vector<1x1x2x32xf32> to vector<2x32xf32>
    %c8 = arith.constant 8 : index
    %c0_57 = arith.constant 0 : index
    %c0_58 = arith.constant 0 : index
    %69 = vector.load %arg3[%c8, %c0_57, %c0_58] : memref<9x32x32xf32, #tpu.memory_space<vmem>>, vector<1x32x32xf32>
    %70 = vector.shape_cast %69 : vector<1x32x32xf32> to vector<32x32xf32>
    %cst_59 = arith.constant dense<0.000000e+00> : vector<2x32xf32>
    %71 = tpu.matmul %68, %70, %cst_59 {dimension_numbers = #tpu.dot_dimension_numbers<[1], [0], [0], [1], [0, 0, 1, 1], [], []>} : vector<2x32xf32>, vector<32x32xf32>, vector<2x32xf32> -> vector<2x32xf32>
    %72 = arith.addf %64, %71 : vector<2x32xf32>
    %cst_60 = arith.constant dense<0.000000e+00> : vector<2xf32>
    %73 = vector.multi_reduction <add>, %72, %cst_60 [1] : vector<2x32xf32> to vector<2xf32>
    %74 = vector.shape_cast %73 : vector<2xf32> to vector<2x1xf32>
    %cst_61 = arith.constant 3.200000e+01 : f32
    %75 = vector.broadcast %cst_61 : f32 to vector<2x1xf32>
    %76 = arith.divf %74, %75 : vector<2x1xf32>
    %77 = vector.broadcast %76 : vector<2x1xf32> to vector<2x32xf32>
    %78 = arith.subf %72, %77 : vector<2x32xf32>
    %79 = arith.mulf %78, %78 : vector<2x32xf32>
    %cst_62 = arith.constant dense<0.000000e+00> : vector<2xf32>
    %80 = vector.multi_reduction <add>, %79, %cst_62 [1] : vector<2x32xf32> to vector<2xf32>
    %81 = vector.shape_cast %80 : vector<2xf32> to vector<2x1xf32>
    %cst_63 = arith.constant 3.200000e+01 : f32
    %82 = vector.broadcast %cst_63 : f32 to vector<2x1xf32>
    %83 = arith.divf %81, %82 : vector<2x1xf32>
    %84 = vector.broadcast %76 : vector<2x1xf32> to vector<2x32xf32>
    %85 = arith.subf %72, %84 : vector<2x32xf32>
    %cst_64 = arith.constant 9.99999997E-7 : f32
    %86 = vector.broadcast %cst_64 : f32 to vector<2x1xf32>
    %87 = arith.addf %83, %86 : vector<2x1xf32>
    %88 = math.rsqrt %87 : vector<2x1xf32>
    %89 = vector.broadcast %88 : vector<2x1xf32> to vector<2x32xf32>
    %90 = arith.mulf %85, %89 : vector<2x32xf32>
    %c0_65 = arith.constant 0 : index
    %c0_66 = arith.constant 0 : index
    %91 = vector.load %arg4[%c0_65, %c0_66] : memref<1x32xf32, #tpu.memory_space<vmem>>, vector<1x32xf32>
    %92 = vector.broadcast %91 : vector<1x32xf32> to vector<2x32xf32>
    %93 = arith.mulf %90, %92 : vector<2x32xf32>
    %c0_67 = arith.constant 0 : index
    %c0_68 = arith.constant 0 : index
    %94 = vector.load %arg5[%c0_67, %c0_68] : memref<1x32xf32, #tpu.memory_space<vmem>>, vector<1x32xf32>
    %95 = vector.broadcast %94 : vector<1x32xf32> to vector<2x32xf32>
    %96 = arith.addf %93, %95 : vector<2x32xf32>
    %c0_69 = arith.constant 0 : index
    %c0_70 = arith.constant 0 : index
    %c0_71 = arith.constant 0 : index
    %c0_72 = arith.constant 0 : index
    %97 = vector.load %arg6[%c0_69, %c0_70, %c0_71, %c0_72] : memref<1x1x2x32xf32, #tpu.memory_space<vmem>>, vector<1x1x2x32xf32>
    %98 = vector.shape_cast %97 : vector<1x1x2x32xf32> to vector<2x32xf32>
    %99 = vector.shape_cast %96 : vector<2x32xf32> to vector<1x1x2x32xf32>
    tpu.vector_store %arg6[%c0_69, %c0_70, %c0_71, %c0_72], %99 {strides = array<i32>} : memref<1x1x2x32xf32, #tpu.memory_space<vmem>>, vector<1x1x2x32xf32>,
    return
  }
  func.func @transform_0(%arg0: i32, %arg1: i32) -> (i32, i32, i32, i32) {
    %c0_i32 = arith.constant 0 : i32
    %c0_i32_0 = arith.constant 0 : i32
    %c0_i32_1 = arith.constant 0 : i32
    %c0_i32_2 = arith.constant 0 : i32
    return %arg0, %c0_i32, %c0_i32_0, %c0_i32_1 : i32, i32, i32, i32
  }
  func.func @transform_1(%arg0: i32, %arg1: i32) -> (i32, i32, i32) {
    %c0_i32 = arith.constant 0 : i32
    %c0_i32_0 = arith.constant 0 : i32
    %c0_i32_1 = arith.constant 0 : i32
    %c0_i32_2 = arith.constant 0 : i32
    return %c0_i32, %c0_i32_0, %c0_i32_1 : i32, i32, i32
  }
  func.func @transform_2(%arg0: i32, %arg1: i32) -> (i32, i32) {
    %c0_i32 = arith.constant 0 : i32
    %c0_i32_0 = arith.constant 0 : i32
    %c0_i32_1 = arith.constant 0 : i32
    return %c0_i32, %c0_i32_0 : i32, i32
  }
  func.func @transform_3(%arg0: i32, %arg1: i32) -> (i32, i32) {
    %c0_i32 = arith.constant 0 : i32
    %c0_i32_0 = arith.constant 0 : i32
    %c0_i32_1 = arith.constant 0 : i32
    return %c0_i32, %c0_i32_0 : i32, i32
  }
  func.func @transform_4(%arg0: i32, %arg1: i32) -> (i32, i32, i32, i32) {
    %c0_i32 = arith.constant 0 : i32
    %c0_i32_0 = arith.constant 0 : i32
    %c0_i32_1 = arith.constant 0 : i32
    return %arg0, %arg1, %c0_i32, %c0_i32_0 : i32, i32, i32, i32
  }
}

</mosaic_0001>

<bundles_post_ra>
// kernel: _lambda_.12
= control target key start
LH: loop header
LB: loop body
LE: loop exit
PB: predicated region body
PF: predicated region fallthrough
CT: control target
= control target key end

     0   :  { %vm21_vm0 = vcmask 261120   ;;  %v166_v7 = vmov 0.0   ;;  %vm167_vm1 = vmmov 0   ;;  %vm136_vm2 = vcmask 785408   ;;  %s228_s0 = inlined_call_operand.vmem [shape: f32[8,32], index: 0, kind: input, shape index: {}]   ;;  %s229_s3 = inlined_call_operand.vmem [shape: f32[32,96], index: 3, kind: input, shape index: {}]   ;;  %s230_s1 = inlined_call_operand.vmem [shape: f32[1,32], index: 1, kind: input, shape index: {}]   ;;  %s231_s2 = inlined_call_operand.vmem [shape: f32[1,32], index: 2, kind: input, shape index: {}]   ;;  %s232_s4 = inlined_call_operand.vmem [shape: f32[1,96], index: 4, kind: input, shape index: {}]   ;;  %s233_s5 = inlined_call_operand.vmem [shape: f32[8,96], index: 5, kind: output, shape index: {}]  }
   0x1   :  { %v20_v0 = vld [vmem:[%s228_s0] sm:$0xff]  ;;  %151 = vmatprep.subr.mxu0 %v166_v7  ;;  %v55_v8 = vld [vmem:[%s229_s3 + $0x18] sm:$0xff]  ;;  %v54_v9 = vld [vmem:[%s229_s3 + $0x10] sm:$0xff]  ;;  %159 = vmatprep.mubr.msk.f32.mxu0 %vm167_vm1, %v166_v7 }
   0x2   :  { %v22_v1 = vsel %vm21_vm0, %v20_v0, 0.0  ;;  %152 = vmatpush3.msra.mxu0 %v55_v8  ;;  %v53_v10 = vld [vmem:[%s229_s3 + $0x8] sm:$0xff]  ;;  %v52_v11 = vld [vmem:[%s229_s3] sm:$0xff] }
   0x3   :  { %23 = vadd.xlane.f32.xlu0 %v22_v1  ;;  %153 = vmatprep.subr.mxu0 %v166_v7  ;;  %v142_v16 = vld [vmem:[%s230_s1] ss:$0 sm:$0xff] }
   0x4   :  { %154 = vmatpush3.msra.mxu0 %v54_v9  ;;  %v143_v18 = vld [vmem:[%s231_s2] ss:$0 sm:$0xff] }
   0x5   :  { %155 = vmatprep.subr.mxu0 %v166_v7  ;;  %v144_v21 = vld [vmem:[%s232_s4] ss:$0 sm:$0xff] }
   0x6   :  { %156 = vmatpush3.msra.mxu0 %v53_v10 }
   0x7   :  { %157 = vmatprep.subr.mxu0 %v166_v7 }
   0x8   :  { %158 = vmatpush3.msra.mxu0 %v52_v11 }
  0x8c   :  { %v24_v2 = vpop.xlane.xlu0 %23 }
  0x8d   :  { %v26_v3 = vmul.f32 0.03125, %v24_v2 }
  0x8f   :  { %v27_v4 = vsub.f32 %v20_v0, %v26_v3 }
  0x91   :  { %v28_v5 = vmul.f32 %v27_v4, %v27_v4 }
  0x93   :  { %v29_v6 = vsel %vm21_vm0, %v28_v5, 0.0 }
  0x94   :  { %30 = vadd.xlane.f32.xlu0 %v29_v6 }
 0x11d   :  { %v31_v12 = vpop.xlane.xlu0 %30 }
 0x11e   :  { %v32_v13 = vmul.f32 0.03125, %v31_v12 }
 0x120   :  { %v33_v14 = vadd.f32 1e-06, %v32_v13 }
 0x122   :  { %164 = vrsqrt.f32 %v33_v14 }
 0x12f   :  { %v165_v15 = vpop.eup %164 }
 0x130   :  { %v35_v17 = vmul.f32 %v165_v15, %v27_v4 }
 0x132   :  { %v43_v19 = vmul.f32 %v142_v16, %v35_v17 }
 0x134   :  { %v51_v20 = vadd.f32 %v143_v18, %v43_v19 }
 0x136   :  { %160 = vmatmul.mubr.msk.f32.vlgmr.msra.gmra.mxu0 %vm21_vm0, %v51_v20 }
 0x1f6   :  { %v132_v22 = vpop.f32.mrf.mxu0 }
 0x1f7   :  { %v133_v23 = vadd.f32 %v144_v21, %v132_v22 }
 0x1f8   :  { %v161_v24 = vpop.f32.mrf.mxu0 }
 0x1f9   :  { %137 = vst.msk [vmem:[%s233_s5] sm:$0xff] %vm136_vm2, %v133_v23 }

// kernel: _lambda_.11
= control target key start
LH: loop header
LB: loop body
LE: loop exit
PB: predicated region body
PF: predicated region fallthrough
CT: control target
= control target key end

     0   :  { %vm333_vm0 = vcmask 261120   ;;  %s777_s1 = inlined_call_operand.vmem [shape: f32[768,32], index: 1, kind: input, shape index: {}]   ;;  %s778_s0 = inlined_call_operand.vmem [shape: f32[8,768], index: 0, kind: input, shape index: {}]   ;;  %s779_s2 = inlined_call_operand.vmem [shape: f32[1,32], index: 2, kind: input, shape index: {}]   ;;  %s780_s3 = inlined_call_operand.vmem [shape: f32[8,32], index: 3, kind: output, shape index: {}]  }
   0x1   :  { %v51_v0 = vld [vmem:[%s777_s1 + $0xf8] sm:$0xff]  ;;  %v50_v2 = vld [vmem:[%s777_s1 + $0xf0] sm:$0xff]  ;;  %v49_v6 = vld [vmem:[%s777_s1 + $0xe8] sm:$0xff] }
   0x2   :  { %v35_v1 = vld [vmem:[%s777_s1 + $0x78] sm:$0xff]  ;;  %340 = vmatprep.subr.mxu0 %v51_v0  ;;  %v34_v4 = vld [vmem:[%s777_s1 + $0x70] sm:$0xff]  ;;  %v33_v8 = vld [vmem:[%s777_s1 + $0x68] sm:$0xff] }
   0x3   :  { %v83_v3 = vld [vmem:[%s777_s1 + $0x1f8] sm:$0xff]  ;;  %341 = vmatpush3.msra.mxu0 %v35_v1  ;;  %v82_v7 = vld [vmem:[%s777_s1 + $0x1f0] sm:$0xff]  ;;  %v81_v10 = vld [vmem:[%s777_s1 + $0x1e8] sm:$0xff] }
   0x4   :  { %v67_v5 = vld [vmem:[%s777_s1 + $0x178] sm:$0xff]  ;;  %375 = vmatprep.subr.mxu1 %v83_v3  ;;  %342 = vmatprep.subr.mxu0 %v50_v2  ;;  %v66_v9 = vld [vmem:[%s777_s1 + $0x170] sm:$0xff]  ;;  %v48_v11 = vld [vmem:[%s777_s1 + $0xe0] sm:$0xff] }
   0x5   :  { %376 = vmatpush3.msra.mxu1 %v67_v5  ;;  %343 = vmatpush3.msra.mxu0 %v34_v4  ;;  %v65_v12 = vld [vmem:[%s777_s1 + $0x168] sm:$0xff]  ;;  %v32_v13 = vld [vmem:[%s777_s1 + $0x60] sm:$0xff]  ;;  %v47_v15 = vld [vmem:[%s777_s1 + $0xd8] sm:$0xff] }
   0x6   :  { %377 = vmatprep.subr.mxu1 %v82_v7  ;;  %344 = vmatprep.subr.mxu0 %v49_v6  ;;  %v80_v14 = vld [vmem:[%s777_s1 + $0x1e0] sm:$0xff]  ;;  %v31_v17 = vld [vmem:[%s777_s1 + $0x58] sm:$0xff]  ;;  %v46_v19 = vld [vmem:[%s777_s1 + $0xd0] sm:$0xff] }
   0x7   :  { %378 = vmatpush3.msra.mxu1 %v66_v9  ;;  %345 = vmatpush3.msra.mxu0 %v33_v8  ;;  %v64_v16 = vld [vmem:[%s777_s1 + $0x160] sm:$0xff]  ;;  %v79_v18 = vld [vmem:[%s777_s1 + $0x1d8] sm:$0xff]  ;;  %v30_v21 = vld [vmem:[%s777_s1 + $0x50] sm:$0xff] }
   0x8   :  { %379 = vmatprep.subr.mxu1 %v81_v10  ;;  %346 = vmatprep.subr.mxu0 %v48_v11  ;;  %v63_v20 = vld [vmem:[%s777_s1 + $0x158] sm:$0xff]  ;;  %v78_v22 = vld [vmem:[%s777_s1 + $0x1d0] sm:$0xff]  ;;  %v45_v23 = vld [vmem:[%s777_s1 + $0xc8] sm:$0xff] }
   0x9   :  { %380 = vmatpush3.msra.mxu1 %v65_v12  ;;  %347 = vmatpush3.msra.mxu0 %v32_v13  ;;  %v62_v24 = vld [vmem:[%s777_s1 + $0x150] sm:$0xff]  ;;  %v29_v25 = vld [vmem:[%s777_s1 + $0x48] sm:$0xff]  ;;  %v44_v27 = vld [vmem:[%s777_s1 + $0xc0] sm:$0xff] }
   0xa   :  { %381 = vmatprep.subr.mxu1 %v80_v14  ;;  %348 = vmatprep.subr.mxu0 %v47_v15  ;;  %v77_v26 = vld [vmem:[%s777_s1 + $0x1c8] sm:$0xff]  ;;  %v28_v29 = vld [vmem:[%s777_s1 + $0x40] sm:$0xff]  ;;  %v43_v31 = vld [vmem:[%s777_s1 + $0xb8] sm:$0xff] }
   0xb   :  { %382 = vmatpush3.msra.mxu1 %v64_v16  ;;  %349 = vmatpush3.msra.mxu0 %v31_v17  ;;  %v61_v28 = vld [vmem:[%s777_s1 + $0x148] sm:$0xff]  ;;  %v76_v30 = vld [vmem:[%s777_s1 + $0x1c0] sm:$0xff]  ;;  %v27_v33 = vld [vmem:[%s777_s1 + $0x38] sm:$0xff] }
   0xc   :  { %383 = vmatprep.subr.mxu1 %v79_v18  ;;  %350 = vmatprep.subr.mxu0 %v46_v19  ;;  %v60_v32 = vld [vmem:[%s777_s1 + $0x140] sm:$0xff]  ;;  %v75_v34 = vld [vmem:[%s777_s1 + $0x1b8] sm:$0xff]  ;;  %v42_v35 = vld [vmem:[%s777_s1 + $0xb0] sm:$0xff] }
   0xd   :  { %384 = vmatpush3.msra.mxu1 %v63_v20  ;;  %351 = vmatpush3.msra.mxu0 %v30_v21  ;;  %v59_v36 = vld [vmem:[%s777_s1 + $0x138] sm:$0xff]  ;;  %v26_v37 = vld [vmem:[%s777_s1 + $0x30] sm:$0xff]  ;;  %v41_v39 = vld [vmem:[%s777_s1 + $0xa8] sm:$0xff] }
   0xe   :  { %385 = vmatprep.subr.mxu1 %v78_v22  ;;  %352 = vmatprep.subr.mxu0 %v45_v23  ;;  %v74_v38 = vld [vmem:[%s777_s1 + $0x1b0] sm:$0xff]  ;;  %v25_v41 = vld [vmem:[%s777_s1 + $0x28] sm:$0xff]  ;;  %v40_v43 = vld [vmem:[%s777_s1 + $0xa0] sm:$0xff] }
   0xf   :  { %386 = vmatpush3.msra.mxu1 %v62_v24  ;;  %353 = vmatpush3.msra.mxu0 %v29_v25  ;;  %v58_v40 = vld [vmem:[%s777_s1 + $0x130] sm:$0xff]  ;;  %v73_v42 = vld [vmem:[%s777_s1 + $0x1a8] sm:$0xff]  ;;  %v24_v45 = vld [vmem:[%s777_s1 + $0x20] sm:$0xff] }
  0x10   :  { %387 = vmatprep.subr.mxu1 %v77_v26  ;;  %354 = vmatprep.subr.mxu0 %v44_v27  ;;  %v57_v44 = vld [vmem:[%s777_s1 + $0x128] sm:$0xff]  ;;  %v72_v46 = vld [vmem:[%s777_s1 + $0x1a0] sm:$0xff]  ;;  %v39_v47 = vld [vmem:[%s777_s1 + $0x98] sm:$0xff] }
  0x11   :  { %388 = vmatpush3.msra.mxu1 %v61_v28  ;;  %355 = vmatpush3.msra.mxu0 %v28_v29  ;;  %v56_v48 = vld [vmem:[%s777_s1 + $0x120] sm:$0xff]  ;;  %v23_v49 = vld [vmem:[%s777_s1 + $0x18] sm:$0xff]  ;;  %v38_v51 = vld [vmem:[%s777_s1 + $0x90] sm:$0xff] }
  0x12   :  { %389 = vmatprep.subr.mxu1 %v76_v30  ;;  %356 = vmatprep.subr.mxu0 %v43_v31  ;;  %v71_v50 = vld [vmem:[%s777_s1 + $0x198] sm:$0xff]  ;;  %v22_v53 = vld [vmem:[%s777_s1 + $0x10] sm:$0xff]  ;;  %v37_v55 = vld [vmem:[%s777_s1 + $0x88] sm:$0xff] }
  0x13   :  { %390 = vmatpush3.msra.mxu1 %v60_v32  ;;  %357 = vmatpush3.msra.mxu0 %v27_v33  ;;  %v55_v52 = vld [vmem:[%s777_s1 + $0x118] sm:$0xff]  ;;  %v70_v54 = vld [vmem:[%s777_s1 + $0x190] sm:$0xff]  ;;  %v21_v57 = vld [vmem:[%s777_s1 + $0x8] sm:$0xff] }
  0x14   :  { %391 = vmatprep.subr.mxu1 %v75_v34  ;;  %358 = vmatprep.subr.mxu0 %v42_v35  ;;  %v54_v56 = vld [vmem:[%s777_s1 + $0x110] sm:$0xff]  ;;  %v69_v58 = vld [vmem:[%s777_s1 + $0x188] sm:$0xff]  ;;  %v36_v59 = vld [vmem:[%s777_s1 + $0x80] sm:$0xff] }
  0x15   :  { %392 = vmatpush3.msra.mxu1 %v59_v36  ;;  %359 = vmatpush3.msra.mxu0 %v26_v37  ;;  %v15_v60 = vld [vmem:[%s778_s0 + $0x8] sm:$0xff]  ;;  %v20_v61 = vld [vmem:[%s777_s1] sm:$0xff]  ;;  %v115_v1 = vld [vmem:[%s777_s1 + $0x2f8] sm:$0xff] }
  0x16   :  { %393 = vmatprep.subr.mxu1 %v74_v38  ;;  %360 = vmatprep.subr.mxu0 %v41_v39  ;;  %v53_v62 = vld [vmem:[%s777_s1 + $0x108] sm:$0xff]  ;;  %v14_v63 = vld [vmem:[%s778_s0] sm:$0xff]  ;;  %v17_v3 = vld [vmem:[%s778_s0 + $0x18] sm:$0xff] }
  0x17   :  { %394 = vmatpush3.msra.mxu1 %v58_v40  ;;  %361 = vmatpush3.msra.mxu0 %v25_v41  ;;  %v68_v0 = vld [vmem:[%s777_s1 + $0x180] sm:$0xff]  ;;  %v99_v4 = vld [vmem:[%s777_s1 + $0x278] sm:$0xff]  ;;  %v16_v5 = vld [vmem:[%s778_s0 + $0x10] sm:$0xff] }
  0x18   :  { %395 = vmatprep.subr.mxu1 %v73_v42  ;;  %362 = vmatprep.subr.mxu0 %v40_v43  ;;  %v52_v2 = vld [vmem:[%s777_s1 + $0x100] sm:$0xff]  ;;  %v114_v6 = vld [vmem:[%s777_s1 + $0x2f0] sm:$0xff]  ;;  %v19_v8 = vld [vmem:[%s778_s0 + $0x28] sm:$0xff] }
  0x19   :  { %396 = vmatpush3.msra.mxu1 %v57_v44  ;;  %363 = vmatpush3.msra.mxu0 %v24_v45  ;;  %v98_v7 = vld [vmem:[%s777_s1 + $0x270] sm:$0xff]  ;;  %v113_v9 = vld [vmem:[%s777_s1 + $0x2e8] sm:$0xff]  ;;  %v112_v11 = vld [vmem:[%s777_s1 + $0x2e0] sm:$0xff] }
  0x1a   :  { %397 = vmatprep.subr.mxu1 %v72_v46  ;;  %364 = vmatprep.subr.mxu0 %v39_v47  ;;  %v97_v10 = vld [vmem:[%s777_s1 + $0x268] sm:$0xff]  ;;  %v96_v12 = vld [vmem:[%s777_s1 + $0x260] sm:$0xff]  ;;  %v111_v13 = vld [vmem:[%s777_s1 + $0x2d8] sm:$0xff] }
  0x1b   :  { %398 = vmatpush3.msra.mxu1 %v56_v48  ;;  %365 = vmatpush3.msra.mxu0 %v23_v49  ;;  %v95_v14 = vld [vmem:[%s777_s1 + $0x258] sm:$0xff]  ;;  %v110_v15 = vld [vmem:[%s777_s1 + $0x2d0] sm:$0xff]  ;;  %v109_v17 = vld [vmem:[%s777_s1 + $0x2c8] sm:$0xff] }
  0x1c   :  { %399 = vmatprep.subr.mxu1 %v71_v50  ;;  %366 = vmatprep.subr.mxu0 %v38_v51  ;;  %v94_v16 = vld [vmem:[%s777_s1 + $0x250] sm:$0xff]  ;;  %v93_v18 = vld [vmem:[%s777_s1 + $0x248] sm:$0xff]  ;;  %v108_v19 = vld [vmem:[%s777_s1 + $0x2c0] sm:$0xff] }
  0x1d   :  { %400 = vmatpush3.msra.mxu1 %v55_v52  ;;  %367 = vmatpush3.msra.mxu0 %v22_v53  ;;  %v92_v20 = vld [vmem:[%s777_s1 + $0x240] sm:$0xff]  ;;  %v107_v21 = vld [vmem:[%s777_s1 + $0x2b8] sm:$0xff]  ;;  %v106_v23 = vld [vmem:[%s777_s1 + $0x2b0] sm:$0xff] }
  0x1e   :  { %401 = vmatprep.subr.mxu1 %v70_v54  ;;  %368 = vmatprep.subr.mxu0 %v37_v55  ;;  %v91_v22 = vld [vmem:[%s777_s1 + $0x238] sm:$0xff]  ;;  %v90_v24 = vld [vmem:[%s777_s1 + $0x230] sm:$0xff]  ;;  %v105_v25 = vld [vmem:[%s777_s1 + $0x2a8] sm:$0xff] }
  0x1f   :  { %402 = vmatpush3.msra.mxu1 %v54_v56  ;;  %369 = vmatpush3.msra.mxu0 %v21_v57  ;;  %v89_v26 = vld [vmem:[%s777_s1 + $0x228] sm:$0xff]  ;;  %v104_v27 = vld [vmem:[%s777_s1 + $0x2a0] sm:$0xff]  ;;  %v103_v29 = vld [vmem:[%s777_s1 + $0x298] sm:$0xff] }
  0x20   :  { %403 = vmatprep.subr.mxu1 %v69_v58  ;;  %370 = vmatprep.subr.mxu0 %v36_v59  ;;  %v88_v28 = vld [vmem:[%s777_s1 + $0x220] sm:$0xff]  ;;  %v87_v30 = vld [vmem:[%s777_s1 + $0x218] sm:$0xff]  ;;  %v102_v31 = vld [vmem:[%s777_s1 + $0x290] sm:$0xff] }
  0x21   :  { %187 = vmatprep.mubr.f32.mxu0 %v15_v60  ;;  %371 = vmatpush3.msra.mxu0 %v20_v61  ;;  %v86_v32 = vld [vmem:[%s777_s1 + $0x210] sm:$0xff]  ;;  %v101_v33 = vld [vmem:[%s777_s1 + $0x288] sm:$0xff]  ;;  %v100_v35 = vld [vmem:[%s777_s1 + $0x280] sm:$0xff] }
  0x22   :  { %404 = vmatpush3.msra.mxu1 %v53_v62  ;;  %188 = vmatmul.mubr.f32.vlgmr.msra.gmra.mxu0 %v14_v63  ;;  %v85_v34 = vld [vmem:[%s777_s1 + $0x208] sm:$0xff]  ;;  %v84_v36 = vld [vmem:[%s777_s1 + $0x200] sm:$0xff] }
  0x23   :  { %405 = vmatprep.subr.mxu1 %v68_v0  ;;  %410 = vmatprep.subr.mxu0 %v115_v1  ;;  %v18_v37 = vld [vmem:[%s778_s0 + $0x20] sm:$0xff] }
  0x24   :  { %406 = vmatpush3.msra.mxu1 %v52_v2  ;;  %257 = vmatprep.mubr.f32.mxu1 %v17_v3  ;;  %v339_v42 = vld [vmem:[%s779_s2] ss:$0 sm:$0xff] }
  0x25   :  { %411 = vmatpush3.msra.mxu0 %v99_v4  ;;  %258 = vmatmul.mubr.f32.vlgmr.msra.gmra.mxu1 %v16_v5 }
  0x26   :  { %412 = vmatprep.subr.mxu0 %v114_v6  ;;  %327 = vmatprep.mubr.f32.mxu0 %v19_v8 }
  0x27   :  { %413 = vmatpush3.msra.mxu0 %v98_v7 }
  0x28   :  { %414 = vmatprep.subr.mxu0 %v113_v9 }
  0x29   :  { %415 = vmatpush3.msra.mxu0 %v97_v10 }
  0x2a   :  { %416 = vmatprep.subr.mxu0 %v112_v11 }
  0x2b   :  { %417 = vmatpush3.msra.mxu0 %v96_v12 }
  0x2c   :  { %418 = vmatprep.subr.mxu0 %v111_v13 }
  0x2d   :  { %419 = vmatpush3.msra.mxu0 %v95_v14 }
  0x2e   :  { %420 = vmatprep.subr.mxu0 %v110_v15 }
  0x2f   :  { %421 = vmatpush3.msra.mxu0 %v94_v16 }
  0x30   :  { %422 = vmatprep.subr.mxu0 %v109_v17 }
  0x31   :  { %423 = vmatpush3.msra.mxu0 %v93_v18 }
  0x32   :  { %424 = vmatprep.subr.mxu0 %v108_v19 }
  0x33   :  { %425 = vmatpush3.msra.mxu0 %v92_v20 }
  0x34   :  { %426 = vmatprep.subr.mxu0 %v107_v21 }
  0x35   :  { %427 = vmatpush3.msra.mxu0 %v91_v22 }
  0x36   :  { %428 = vmatprep.subr.mxu0 %v106_v23 }
  0x37   :  { %429 = vmatpush3.msra.mxu0 %v90_v24 }
  0x38   :  { %430 = vmatprep.subr.mxu0 %v105_v25 }
  0x39   :  { %431 = vmatpush3.msra.mxu0 %v89_v26 }
  0x3a   :  { %432 = vmatprep.subr.mxu0 %v104_v27 }
  0x3b   :  { %433 = vmatpush3.msra.mxu0 %v88_v28 }
  0x3c   :  { %434 = vmatprep.subr.mxu0 %v103_v29 }
  0x3d   :  { %435 = vmatpush3.msra.mxu0 %v87_v30 }
  0x3e   :  { %436 = vmatprep.subr.mxu0 %v102_v31 }
  0x3f   :  { %437 = vmatpush3.msra.mxu0 %v86_v32 }
  0x40   :  { %438 = vmatprep.subr.mxu0 %v101_v33 }
  0x41   :  { %439 = vmatpush3.msra.mxu0 %v85_v34 }
  0x42   :  { %440 = vmatprep.subr.mxu0 %v100_v35 }
  0x43   :  { %441 = vmatpush3.msra.mxu0 %v84_v36 }
  0x44   :  { %328 = vmatmul.mubr.f32.vlgmr.msra.gmra.mxu0 %v18_v37 }
  0xe2   :  { %v372_v38 = vpop.f32.mrf.mxu0 }
  0xe4   :  { %v373_v39 = vpop.f32.mrf.mxu0 }
  0xe5   :  { %v407_v40 = vpop.f32.mrf.mxu1  ;;  %v374_v41 = vadd.f32 %v373_v39, %v372_v38 }
  0xe7   :  { %v408_v43 = vpop.f32.mrf.mxu1  ;;  %v190_v44 = vadd.f32 %v374_v41, %v339_v42 }
  0xe8   :  { %v409_v45 = vadd.f32 %v408_v43, %v407_v40 }
  0xea   :  { %v260_v48 = vadd.f32 %v409_v45, %v190_v44 }
 0x104   :  { %v442_v46 = vpop.f32.mrf.mxu0 }
 0x106   :  { %v443_v47 = vpop.f32.mrf.mxu0 }
 0x107   :  { %v444_v49 = vadd.f32 %v443_v47, %v442_v46 }
 0x109   :  { %v330_v50 = vadd.f32 %v444_v49, %v260_v48 }
 0x10b   :  { %334 = vst.msk [vmem:[%s780_s3] sm:$0xff] %vm333_vm0, %v330_v50 }

// kernel: _lambda_.14
= control target key start
LH: loop header
LB: loop body
LE: loop exit
PB: predicated region body
PF: predicated region fallthrough
CT: control target
= control target key end

     0   :  { %v130_v0 = vmov 0.0   ;;  %vm131_vm0 = vmmov 0   ;;  %vm29_vm1 = vcmask 261120   ;;  %s181_s1 = inlined_call_operand.vmem [shape: f32[32,32], index: 1, kind: input, shape index: {}]   ;;  %s182_s0 = inlined_call_operand.vmem [shape: f32[8,32], index: 0, kind: input, shape index: {}]   ;;  %s183_s2 = inlined_call_operand.vmem [shape: f32[1,32], index: 2, kind: input, shape index: {}]   ;;  %s184_s3 = inlined_call_operand.vmem [shape: f32[8,32], index: 3, kind: input, shape index: {}]   ;;  %s185_s4 = inlined_call_operand.vmem [shape: f32[8,32], index: 4, kind: output, shape index: {}]  }
   0x1   :  { %117 = vmatprep.subr.mxu0 %v130_v0  ;;  %v21_v1 = vld [vmem:[%s181_s1 + $0x18] sm:$0xff]  ;;  %v20_v2 = vld [vmem:[%s181_s1 + $0x10] sm:$0xff]  ;;  %125 = vmatprep.mubr.msk.f32.mxu0 %vm131_vm0, %v130_v0  ;;  %v19_v3 = vld [vmem:[%s181_s1 + $0x8] sm:$0xff] }
   0x2   :  { %118 = vmatpush3.msra.mxu0 %v21_v1  ;;  %v18_v4 = vld [vmem:[%s181_s1] sm:$0xff] }
   0x3   :  { %119 = vmatprep.subr.mxu0 %v130_v0  ;;  %v17_v5 = vld [vmem:[%s182_s0] sm:$0xff] }
   0x4   :  { %120 = vmatpush3.msra.mxu0 %v20_v2  ;;  %v110_v6 = vld [vmem:[%s183_s2] ss:$0 sm:$0xff] }
   0x5   :  { %121 = vmatprep.subr.mxu0 %v130_v0  ;;  %v103_v8 = vld [vmem:[%s184_s3] sm:$0xff] }
   0x6   :  { %122 = vmatpush3.msra.mxu0 %v19_v3 }
   0x7   :  { %123 = vmatprep.subr.mxu0 %v130_v0 }
   0x8   :  { %124 = vmatpush3.msra.mxu0 %v18_v4 }
   0x9   :  { %126 = vmatmul.mubr.msk.f32.vlgmr.msra.gmra.mxu0 %vm29_vm1, %v17_v5 }
  0xc9   :  { %v99_v7 = vpop.f32.mrf.mxu0 }
  0xca   :  { %v100_v9 = vadd.f32 %v110_v6, %v99_v7 }
  0xcb   :  { %v127_v10 = vpop.f32.mrf.mxu0 }
  0xcc   :  { %v104_v11 = vadd.f32 %v103_v8, %v100_v9 }
  0xce   :  { %105 = vst.msk [vmem:[%s185_s4] sm:$0xff] %vm29_vm1, %v104_v11 }

// kernel: _lambda_.13
= control target key start
LH: loop header
LB: loop body
LE: loop exit
PB: predicated region body
PF: predicated region fallthrough
CT: control target
= control target key end

     0   :  { %s697_s12 = smov 0   ;;  %s699_s13 = smov 0   ;;  %s751_s0 = inlined_call_operand.vmem [shape: f32[8,4,8], index: 0, kind: input, shape index: {}]   ;;  %s752_s1 = inlined_call_operand.vmem [shape: f32[8,4,8], index: 1, kind: input, shape index: {}]   ;;  %s753_s2 = inlined_call_operand.vmem [shape: f32[8,4,8], index: 2, kind: input, shape index: {}]   ;;  %s754_s3 = inlined_call_operand.vmem [shape: f32[8,4,8], index: 3, kind: output, shape index: {}]  }
   0x1   :  { %s701_s14 = smov 0  }
   0x2 LB: > { %s32_s15 = sadd.s32 1, %s667_s13  ;;  %p588_p0 = scmp.ge.s32.totalorder %s671_s14, 1  ;;  %s671_s14 = sphi %s701_s14, %s13_s14   ;;  %s667_s13 = sphi %s699_s13, %s756_s13   ;;  %s663_s12 = sphi %s697_s12, %s755_s12  }
   0x3   : > { %p34_p1 = scmp.ge.s32.totalorder %s32_s15, 8  ;;  %p190_p2 = scmp.lt.s32.totalorder %s671_s14, 9 }
   0x5   : > { %s758_s15 = smov (%p34_p1, %s32_s15), 0  ;;  %p191_p3 = pnand %p588_p0, %p190_p2 }
   0x6   : > { %p232_p4 = scmp.lt.s32.totalorder (!%p191_p3), %s663_s12, 7 }
   0x7   : > { %194 = sbr.rel (%p191_p3) target bundleno = 785 (0x311), region = 32 }
   0xc   : > { %vm267_vm0 = vcmask 60416   ;;  %v673_v0 = vmov 0.0   ;;  %vm674_vm1 = vmmov 0   ;;  %s760_s12 = smov (!%p232_p4, %s663_s12), 7  ;;  %vm272_vm2 = vcmask 64512  }
   0xd   : > { %268 = vst.msk [vmem:[#allocation4] sm:$0xf] %vm267_vm0, %v673_v0  ;;  %603 = vmatprep.subr.mxu0 %v673_v0  ;;  %605 = vmatprep.mubr.msk.f32.mxu0 %vm674_vm1, %v673_v0  ;;  %s716_s16 = sshll.u32 %s760_s12, 2  ;;  %vm264_vm3 = vcmask 3072   ;;  %v675_v4 = vmov -inf   ;;  %vm350_vm4 = vcmask 27648  }
   0xe   : > { %608 = vmatprep.subr.mxu1 %v673_v0  ;;  %610 = vmatprep.mubr.msk.f32.mxu1 %vm674_vm1, %v673_v0  ;;  %s245_s19 = scalar_lea.vmem %s752_s1, %s716_s16  ;;  %s238_s22 = scalar_lea.vmem %s751_s0, %s716_s16  ;;  %265 = vst.msk [vmem:[#allocation2] sm:$0xf] %vm264_vm3, %v675_v4  ;;  %266 = vst.msk [vmem:[#allocation3] sm:$0xf] %vm264_vm3, %v673_v0  ;;  %v676_v8 = vmov 0   ;;  %vm386_vm5 = vcmask 1043456  }
   0xf   : > { %v271_v1 = vld [vmem:[%s245_s19] sm:$0xf]  ;;  %641 = vset.pattern.permute.xlu0 %v676_v8  ;;  %642 = vset.pattern.permute.xlu1 %v676_v8  ;;  %s252_s25 = scalar_lea.vmem %s753_s2, %s716_s16  ;;  %vm382_vm6 = vcmask 31744   ;;  %s259_s28 = scalar_lea.vmem %s754_s3, %s716_s16 }
  0x10   : > { %v269_v2 = vld [vmem:[%s238_s22] sm:$0xf]  ;;  %604 = vmatpush3.xpose.msk.msra.mxu0 %vm272_vm2, %v271_v1 }
  0x11   : > { %v270_v3 = vmul.f32 0.35355338, %v269_v2  ;;  %v381_v13 = vld [vmem:[%s252_s25] sm:$0xf] }
  0x12   : > { %609 = vmatpush3.msk.msra.mxu1 %vm386_vm5, %v381_v13 }
  0x13   : > { %606 = vmatmul.mubr.msk.f32.vlgmr.msra.gmra.mxu0 %vm272_vm2, %v270_v3 }
  0x14   : > { %v374_v27 = vld [vmem:[#allocation4] sm:$0xf] }
  0x15   : > { %v349_v9 = vld [vmem:[#allocation2] sm:$0xf]  ;;  %v366_v21 = vld [vmem:[#allocation3] sm:$0xf] }
  0xd3   : > { %v345_v5 = vpop.f32.mrf.mxu0 }
  0xd4   : > { %v351_v6 = vsel %vm350_vm4, %v345_v5, -inf }
  0xd5   : > { %352 = vmax.xlane.f32.xlu0 %v351_v6  ;;  %v607_v7 = vpop.f32.mrf.mxu0 }
 0x15e   : > { %v353_v10 = vpop.xlane.xlu0 %352 }
 0x15f   : > { %v354_v11 = vmax.f32 %v349_v9, %v353_v10 }
 0x161   : > { %v355_v12 = vsub.f32 %v349_v9, %v354_v11  ;;  %463 = vst.msk [vmem:[#allocation2] sm:$0xf] %vm264_vm3, %v354_v11  ;;  %360 = vperm.xlu0 %641, %v354_v11  }
 0x163   : > { %v356_v18 = vmul.f32 1.442695, %v355_v12 }
 0x1dc   : > { %v361_v14 = vpop.permute.xlu0 %360 }
 0x1dd   : > { %v363_v15 = vsub.f32 %v345_v5, %v361_v14 }
 0x1df   : > { %v364_v16 = vmul.f32 1.442695, %v363_v15 }
 0x1e1   : > { %643 = vpow2.f32 %v364_v16 }
 0x1e2   : > { %645 = vpow2.f32 %v356_v18 }
 0x1ee   : > { %v644_v17 = vpop.eup %643 }
 0x1ef   : > { %611 = vmatmul.mubr.msk.f32.vlgmr.msra.gmra.mxu1 %vm382_vm6, %v644_v17  ;;  %v368_v19 = vsel %vm350_vm4, %v644_v17, 0.0  ;;  %v646_v20 = vpop.eup %645 }
 0x1f0   : > { %369 = vadd.xlane.f32.xlu1 %v368_v19  ;;  %v367_v22 = vmul.f32 %v646_v20, %v366_v21 }
 0x201   : > { %377 = vperm.xlu1 %642, %v646_v20  }
 0x279   : > { %v370_v23 = vpop.xlane.xlu1 %369 }
 0x27a   : > { %v371_v24 = vadd.f32 %v370_v23, %v367_v22 }
 0x27c   : > { %373 = vst.msk [vmem:[#allocation3] sm:$0xf] %vm264_vm3, %v371_v24 }
 0x27d   : > { %v378_v28 = vpop.permute.xlu1 %377 }
 0x27e   : > { %v380_v29 = vmul.f32 %v378_v28, %v374_v27 }
 0x283   : > { %v468_v25 = vld [vmem:[#allocation3] sm:$0xf] }
 0x284   : > { %647 = vrcp.f32 %v468_v25 }
 0x291   : > { %v648_v26 = vpop.eup %647 }
 0x292   : > { %472 = vperm.xlu1 %642, %v648_v26  }
 0x2af   : > { %v456_v30 = vpop.f32.mrf.mxu1 }
 0x2b0   : > { %v460_v31 = vadd.f32 %v456_v30, %v380_v29 }
 0x2b1   : > { %v612_v32 = vpop.f32.mrf.mxu1 }
 0x2b2   : > { %462 = vst.msk [vmem:[#allocation4] sm:$0xf] %vm267_vm0, %v460_v31 }
 0x2b9   : > { %v467_v33 = vld [vmem:[#allocation4] sm:$0xf] }
 0x30d   : > { %v473_v34 = vpop.permute.xlu1 %472 }
 0x30e   : > { %v475_v35 = vmul.f32 %v473_v34, %v467_v33 }
 0x310   : > { %476 = vst.msk [vmem:[%s259_s28] sm:$0xf] %vm267_vm0, %v475_v35 }
 0x311 PF: > { %s13_s14 = sadd.s32 1, %s671_s14   ;;  %s755_s12 = smov %s667_s13 }
 0x312   : > { %p10_p5 = scmp.ge.s32.totalorder %s13_s14, 10   ;;  %s756_s13 = smov %s758_s15 }
 0x314   :  { %12 = sbr.rel (!%p10_p5) target bundleno = 2 (0x2), region = 76 }

// kernel: _lambda_.20
= control target key start
LH: loop header
LB: loop body
LE: loop exit
PB: predicated region body
PF: predicated region fallthrough
CT: control target
= control target key end

     0   :  { %v154_v0 = vmov 0.0   ;;  %vm155_vm0 = vmmov 0   ;;  %vm22_vm1 = vcmask 261120   ;;  %s209_s1 = inlined_call_operand.vmem [shape: f32[32,32], index: 1, kind: input, shape index: {}]   ;;  %s210_s0 = inlined_call_operand.vmem [shape: f32[8,32], index: 0, kind: input, shape index: {}]   ;;  %s211_s2 = inlined_call_operand.vmem [shape: f32[1,32], index: 2, kind: input, shape index: {}]   ;;  %s212_s3 = inlined_call_operand.vmem [shape: f32[1,32], index: 3, kind: input, shape index: {}]   ;;  %s213_s4 = inlined_call_operand.vmem [shape: f32[8,32], index: 4, kind: output, shape index: {}]  }
   0x1   :  { %139 = vmatprep.subr.mxu0 %v154_v0  ;;  %v21_v1 = vld [vmem:[%s209_s1 + $0x18] sm:$0xff]  ;;  %v20_v2 = vld [vmem:[%s209_s1 + $0x10] sm:$0xff]  ;;  %147 = vmatprep.mubr.msk.f32.mxu0 %vm155_vm0, %v154_v0  ;;  %v19_v3 = vld [vmem:[%s209_s1 + $0x8] sm:$0xff] }
   0x2   :  { %140 = vmatpush3.msra.mxu0 %v21_v1  ;;  %v18_v4 = vld [vmem:[%s209_s1] sm:$0xff] }
   0x3   :  { %141 = vmatprep.subr.mxu0 %v154_v0  ;;  %v17_v5 = vld [vmem:[%s210_s0] sm:$0xff] }
   0x4   :  { %142 = vmatpush3.msra.mxu0 %v20_v2  ;;  %v132_v18 = vld [vmem:[%s211_s2] ss:$0 sm:$0xff] }
   0x5   :  { %143 = vmatprep.subr.mxu0 %v154_v0  ;;  %v133_v20 = vld [vmem:[%s212_s3] ss:$0 sm:$0xff] }
   0x6   :  { %144 = vmatpush3.msra.mxu0 %v19_v3 }
   0x7   :  { %145 = vmatprep.subr.mxu0 %v154_v0 }
   0x8   :  { %146 = vmatpush3.msra.mxu0 %v18_v4 }
   0x9   :  { %148 = vmatmul.mubr.msk.f32.vlgmr.msra.gmra.mxu0 %vm22_vm1, %v17_v5 }
  0xc9   :  { %v92_v6 = vpop.f32.mrf.mxu0 }
  0xca   :  { %v96_v7 = vsel %vm22_vm1, %v92_v6, 0.0 }
  0xcb   :  { %97 = vadd.xlane.f32.xlu0 %v96_v7  ;;  %v149_v8 = vpop.f32.mrf.mxu0 }
 0x154   :  { %v98_v9 = vpop.xlane.xlu0 %97 }
 0x155   :  { %v100_v10 = vmul.f32 0.03125, %v98_v9 }
 0x157   :  { %v101_v11 = vsub.f32 %v92_v6, %v100_v10 }
 0x159   :  { %v102_v12 = vmul.f32 %v101_v11, %v101_v11 }
 0x15b   :  { %v103_v13 = vsel %vm22_vm1, %v102_v12, 0.0 }
 0x15c   :  { %104 = vadd.xlane.f32.xlu0 %v103_v13 }
 0x1e5   :  { %v105_v14 = vpop.xlane.xlu0 %104 }
 0x1e6   :  { %v106_v15 = vmul.f32 0.03125, %v105_v14 }
 0x1e8   :  { %v107_v16 = vadd.f32 1e-06, %v106_v15 }
 0x1ea   :  { %152 = vrsqrt.f32 %v107_v16 }
 0x1f7   :  { %v153_v17 = vpop.eup %152 }
 0x1f8   :  { %v109_v19 = vmul.f32 %v153_v17, %v101_v11 }
 0x1fa   :  { %v117_v21 = vmul.f32 %v132_v18, %v109_v19 }
 0x1fc   :  { %v125_v22 = vadd.f32 %v133_v20, %v117_v21 }
 0x1fe   :  { %126 = vst.msk [vmem:[%s213_s4] sm:$0xff] %vm22_vm1, %v125_v22 }

// kernel: _lambda_.15
= control target key start
LH: loop header
LB: loop body
LE: loop exit
PB: predicated region body
PF: predicated region fallthrough
CT: control target
= control target key end

     0   :  { %vm27_vm0 = vcmask 261120   ;;  %v329_v7 = vmov 0.0   ;;  %vm330_vm1 = vmmov 0   ;;  %s480_s0 = inlined_call_operand.vmem [shape: f32[8,32], index: 0, kind: input, shape index: {}]   ;;  %s481_s3 = inlined_call_operand.vmem [shape: f32[32,128], index: 3, kind: input, shape index: {}]   ;;  %s482_s1 = inlined_call_operand.vmem [shape: f32[1,32], index: 1, kind: input, shape index: {}]   ;;  %s483_s2 = inlined_call_operand.vmem [shape: f32[1,32], index: 2, kind: input, shape index: {}]   ;;  %s484_s5 = inlined_call_operand.vmem [shape: f32[128,32], index: 5, kind: input, shape index: {}]   ;;  %s485_s4 = inlined_call_operand.vmem [shape: f32[1,128], index: 4, kind: input, shape index: {}]   ;;  %s486_s6 = inlined_call_operand.vmem [shape: f32[1,32], index: 6, kind: input, shape index: {}]   ;;  %s487_s7 = inlined_call_operand.vmem [shape: f32[8,32], index: 7, kind: output, shape index: {}]  }
   0x1   :  { %v374_v0 = vld [vmem:[%s480_s0] sm:$0xff]  ;;  %277 = vmatprep.subr.mxu0 %v329_v7  ;;  %v61_v8 = vld [vmem:[%s481_s3 + $0x18] sm:$0xff]  ;;  %v60_v9 = vld [vmem:[%s481_s3 + $0x10] sm:$0xff]  ;;  %285 = vmatprep.mubr.msk.f32.mxu0 %vm330_vm1, %v329_v7 }
   0x2   :  { %v28_v1 = vsel %vm27_vm0, %v374_v0, 0.0  ;;  %278 = vmatpush3.msra.mxu0 %v61_v8  ;;  %288 = vmatprep.subr.mxu1 %v329_v7  ;;  %v59_v10 = vld [vmem:[%s481_s3 + $0x8] sm:$0xff]  ;;  %v58_v11 = vld [vmem:[%s481_s3] sm:$0xff]  ;;  %v166_v21 = vld [vmem:[%s484_s5 + $0x78] sm:$0xff] }
   0x3   :  { %29 = vadd.xlane.f32.xlu0 %v28_v1  ;;  %279 = vmatprep.subr.mxu0 %v329_v7  ;;  %v250_v16 = vld [vmem:[%s482_s1] ss:$0 sm:$0xff]  ;;  %v165_v22 = vld [vmem:[%s484_s5 + $0x70] sm:$0xff]  ;;  %v164_v23 = vld [vmem:[%s484_s5 + $0x68] sm:$0xff] }
   0x4   :  { %320 = vmatprep.mubr.msk.f32.mxu1 %vm330_vm1, %v329_v7  ;;  %280 = vmatpush3.msra.mxu0 %v60_v9  ;;  %v251_v18 = vld [vmem:[%s483_s2] ss:$0 sm:$0xff]  ;;  %v162_v25 = vld [vmem:[%s484_s5 + $0x58] sm:$0xff]  ;;  %v161_v26 = vld [vmem:[%s484_s5 + $0x50] sm:$0xff] }
   0x5   :  { %281 = vmatprep.subr.mxu0 %v329_v7  ;;  %289 = vmatpush3.msra.mxu1 %v166_v21  ;;  %v163_v24 = vld [vmem:[%s484_s5 + $0x60] sm:$0xff]  ;;  %v160_v27 = vld [vmem:[%s484_s5 + $0x48] sm:$0xff]  ;;  %v158_v29 = vld [vmem:[%s484_s5 + $0x38] sm:$0xff] }
   0x6   :  { %282 = vmatpush3.msra.mxu0 %v59_v10  ;;  %290 = vmatprep.subr.mxu1 %v329_v7  ;;  %v159_v28 = vld [vmem:[%s484_s5 + $0x40] sm:$0xff]  ;;  %v157_v30 = vld [vmem:[%s484_s5 + $0x30] sm:$0xff]  ;;  %v156_v31 = vld [vmem:[%s484_s5 + $0x28] sm:$0xff] }
   0x7   :  { %283 = vmatprep.subr.mxu0 %v329_v7  ;;  %291 = vmatpush3.msra.mxu1 %v165_v22  ;;  %v155_v32 = vld [vmem:[%s484_s5 + $0x20] sm:$0xff]  ;;  %v154_v33 = vld [vmem:[%s484_s5 + $0x18] sm:$0xff]  ;;  %v153_v34 = vld [vmem:[%s484_s5 + $0x10] sm:$0xff] }
   0x8   :  { %284 = vmatpush3.msra.mxu0 %v58_v11  ;;  %292 = vmatprep.subr.mxu1 %v329_v7  ;;  %v152_v35 = vld [vmem:[%s484_s5 + $0x8] sm:$0xff]  ;;  %v151_v36 = vld [vmem:[%s484_s5] sm:$0xff] }
   0x9   :  { %293 = vmatpush3.msra.mxu1 %v164_v23  ;;  %v252_v37 = vld [vmem:[%s485_s4] ss:$0 sm:$0xff] }
   0xa   :  { %294 = vmatprep.subr.mxu1 %v329_v7  ;;  %v254_v50 = vld [vmem:[%s486_s6] ss:$0 sm:$0xff] }
   0xb   :  { %295 = vmatpush3.msra.mxu1 %v163_v24 }
   0xc   :  { %296 = vmatprep.subr.mxu1 %v329_v7 }
   0xd   :  { %297 = vmatpush3.msra.mxu1 %v162_v25 }
   0xe   :  { %298 = vmatprep.subr.mxu1 %v329_v7 }
   0xf   :  { %299 = vmatpush3.msra.mxu1 %v161_v26 }
  0x10   :  { %300 = vmatprep.subr.mxu1 %v329_v7 }
  0x11   :  { %301 = vmatpush3.msra.mxu1 %v160_v27 }
  0x12   :  { %302 = vmatprep.subr.mxu1 %v329_v7 }
  0x13   :  { %303 = vmatpush3.msra.mxu1 %v159_v28 }
  0x14   :  { %304 = vmatprep.subr.mxu1 %v329_v7 }
  0x15   :  { %305 = vmatpush3.msra.mxu1 %v158_v29 }
  0x16   :  { %306 = vmatprep.subr.mxu1 %v329_v7 }
  0x17   :  { %307 = vmatpush3.msra.mxu1 %v157_v30 }
  0x18   :  { %308 = vmatprep.subr.mxu1 %v329_v7 }
  0x19   :  { %309 = vmatpush3.msra.mxu1 %v156_v31 }
  0x1a   :  { %310 = vmatprep.subr.mxu1 %v329_v7 }
  0x1b   :  { %311 = vmatpush3.msra.mxu1 %v155_v32 }
  0x1c   :  { %312 = vmatprep.subr.mxu1 %v329_v7 }
  0x1d   :  { %313 = vmatpush3.msra.mxu1 %v154_v33 }
  0x1e   :  { %314 = vmatprep.subr.mxu1 %v329_v7 }
  0x1f   :  { %315 = vmatpush3.msra.mxu1 %v153_v34 }
  0x20   :  { %316 = vmatprep.subr.mxu1 %v329_v7 }
  0x21   :  { %317 = vmatpush3.msra.mxu1 %v152_v35 }
  0x22   :  { %318 = vmatprep.subr.mxu1 %v329_v7 }
  0x23   :  { %319 = vmatpush3.msra.mxu1 %v151_v36 }
  0x8c   :  { %v30_v2 = vpop.xlane.xlu0 %29 }
  0x8d   :  { %v32_v3 = vmul.f32 0.03125, %v30_v2 }
  0x8f   :  { %v33_v4 = vsub.f32 %v374_v0, %v32_v3 }
  0x91   :  { %v34_v5 = vmul.f32 %v33_v4, %v33_v4 }
  0x93   :  { %v35_v6 = vsel %vm27_vm0, %v34_v5, 0.0 }
  0x94   :  { %36 = vadd.xlane.f32.xlu0 %v35_v6 }
 0x11d   :  { %v37_v12 = vpop.xlane.xlu0 %36 }
 0x11e   :  { %v38_v13 = vmul.f32 0.03125, %v37_v12 }
 0x120   :  { %v39_v14 = vadd.f32 1e-06, %v38_v13 }
 0x122   :  { %325 = vrsqrt.f32 %v39_v14 }
 0x12f   :  { %v326_v15 = vpop.eup %325 }
 0x130   :  { %v41_v17 = vmul.f32 %v326_v15, %v33_v4 }
 0x132   :  { %v49_v19 = vmul.f32 %v250_v16, %v41_v17 }
 0x134   :  { %v57_v20 = vadd.f32 %v251_v18, %v49_v19 }
 0x136   :  { %286 = vmatmul.mubr.msk.f32.vlgmr.msra.gmra.mxu0 %vm27_vm0, %v57_v20 }
 0x1f6   :  { %v138_v38 = vpop.f32.mrf.mxu0 }
 0x1f7   :  { %v139_v39 = vadd.f32 %v252_v37, %v138_v38 }
 0x1f8   :  { %v287_v40 = vpop.f32.mrf.mxu0 }
 0x1f9   :  { %v142_v41 = vmul.f32 %v139_v39, %v139_v39 }
 0x1fb   :  { %v143_v42 = vmul.f32 %v142_v41, %v139_v39 }
 0x1fd   :  { %v144_v43 = vmul.f32 0.044715, %v143_v42 }
 0x1ff   :  { %v145_v44 = vadd.f32 %v144_v43, %v139_v39 }
 0x201   :  { %v146_v45 = vmul.f32 0.7978846, %v145_v44 }
 0x203   :  { %327 = vtanh.f32 %v146_v45 }
 0x210   :  { %v328_v46 = vpop.eup %327 }
 0x211   :  { %v148_v47 = vadd.f32 1.0, %v328_v46 }
 0x213   :  { %v149_v48 = vmul.f32 0.5, %v148_v47 }
 0x215   :  { %v150_v49 = vmul.f32 %v149_v48, %v139_v39 }
 0x217   :  { %321 = vmatmul.mubr.f32.vlgmr.msra.gmra.mxu1 %v150_v49 }
 0x2d7   :  { %v240_v51 = vpop.f32.mrf.mxu1 }
 0x2d8   :  { %v241_v52 = vadd.f32 %v254_v50, %v240_v51 }
 0x2d9   :  { %v322_v53 = vpop.f32.mrf.mxu1 }
 0x2da   :  { %v244_v54 = vadd.f32 %v241_v52, %v374_v0 }
 0x2dc   :  { %245 = vst.msk [vmem:[%s487_s7] sm:$0xff] %vm27_vm0, %v244_v54 }

// kernel: _lambda_.21
= control target key start
LH: loop header
LB: loop body
LE: loop exit
PB: predicated region body
PF: predicated region fallthrough
CT: control target
= control target key end

     0   :  { %9 = vsyncpa [#allocation3], 0  ;;  %s1785_s0 = inlined_call_operand.vmem [shape: f32[2,4,4,32], index: 0, kind: input, shape index: {}]   ;;  %s1786_s1 = inlined_call_operand.vmem [shape: f32[9,32,32], index: 1, kind: input, shape index: {}]   ;;  %s1787_s2 = inlined_call_operand.vmem [shape: f32[1,32], index: 2, kind: input, shape index: {}]   ;;  %s1788_s3 = inlined_call_operand.vmem [shape: f32[1,32], index: 3, kind: input, shape index: {}]   ;;  %s1789_s4 = inlined_call_operand.hbm [shape: f32[2,2,2,32], index: 4, kind: output, shape index: {}]  }
   0x1   :  { %11 = vsyncpa [#allocation3 + $0x1], 0  ;;  %s1471_s15 = smov 0   ;;  %s1473_s16 = smov 0  }
   0x2   :  { %s1475_s17 = smov 0   ;;  %s1477_s18 = smov 0  }
   0x3   :  { %s1479_s19 = smov 0   ;;  %s1481_s20 = smov 0  }
   0x4   :  { %s1483_s21 = smov 0   ;;  %s1485_s22 = smov 0  }
   0x5 LB: > { %s1064_s23 = sadd.s32 4294967295, %s1441_s22   ;;  %s1065_s24 = sadd.s32 4294967294, %s1441_s22   ;;  %s1441_s22 = sphi %s1485_s22, %s17_s22   ;;  %s1437_s21 = sphi %s1483_s21, %s1798_s21   ;;  %s1433_s20 = sphi %s1481_s20, %s1797_s20   ;;  %s1429_s19 = sphi %s1479_s19, %s1796_s19   ;;  %s1425_s18 = sphi %s1477_s18, %s1795_s18   ;;  %s1421_s17 = sphi %s1475_s17, %s1794_s17   ;;  %s1417_s16 = sphi %s1473_s16, %s1793_s16   ;;  %s1413_s15 = sphi %s1471_s15, %s1792_s15  }
   0x6   : > { %s26_s25 = sadd.s32 1, %s1433_s20  ;;  %s29_s26 = sadd.s32 1, %s1437_s21 }
   0x7   : > { %p27_p0 = scmp.ge.s32.totalorder %s26_s25, 2  ;;  %p137_p1 = scmp.ne.s32.totalorder %s1421_s17, %s1417_s16 }
   0x8   : > { %p138_p2 = scmp.eq.s32.totalorder %s1064_s23, 3  ;;  %p143_p5 = scmp.ne.s32.totalorder %s1417_s16, %s1413_s15 }
   0x9   : > { %s1800_s25 = smov (%p27_p0, %s26_s25), 0  ;;  %s1802_s26 = smov (!%p27_p0, %s29_s26), %s1437_s21 }
   0xa   : > { %s123_s27 = ssub.s32 %s1433_s20, %s1800_s25  ;;  %p1522_p3 = por %p138_p2, %p137_p1 }
   0xb   : > { %p31_p4 = scmp.ge.s32.totalorder %s1802_s26, 2  ;;  %p144_p6 = scmp.eq.s32.totalorder %s1065_s24, 3 }
   0xc   : > { %p1068_p7 = scmp.ge.s32.totalorder %s1441_s22, 1  ;;  %p179_p9 = scmp.lt.s32.totalorder %s1441_s22, 5 }
   0xd   : > { %s1804_s26 = smov (%p31_p4, %s1802_s26), 0  ;;  %p1531_p8 = por %p144_p6, %p143_p5 }
   0xe   : > { %s122_s30 = ssub.s32 %s1437_s21, %s1804_s26  ;;  %s127_s5 = sadd.s32 1, %s1421_s17 }
   0xf   : > { %s124_s6 = sor.u32 %s123_s27, %s122_s30  ;;  %p180_p10 = pnand %p1068_p7, %p179_p9 }
  0x10   : > { %p125_p11 = scmp.eq.s32.totalorder %s124_s6, 0  ;;  %p205_p12 = scmp.lt.s32.totalorder (!%p180_p10), %s1429_s19, 1 }
  0x11   : > { %183 = sbr.rel (%p180_p10) target bundleno = 586 (0x24a), region = 36  ;;  %s1072_s8 = sshll.u32 (!%p180_p10), %s1425_s18, 2 }
  0x12   : > { %s1540_s7 = scalar_select %p125_p11, %s1421_s17, %s127_s5  }
  0x13   : > { %s1445_s27 = smov (!%p180_p10), [#allocation2]  }
  0x14   : > { %s1353_s30 = sshll.u32 (!%p180_p10), %s1445_s27, 4  ;;  %s1354_s30 = int_to_ptr.vmem [resolvable:$false] %s1353_s30 }
  0x16   : > { %v1076_v0 = vld [vmem:[%s1786_s1 + $0x38] sm:$0xff]  ;;  %v1443_v2 = vmov 0.0   ;;  %v1075_v3 = vld [vmem:[%s1786_s1 + $0x30] sm:$0xff]  ;;  %s206_s24 = scalar_select %p205_p12, %s1429_s19, 1  ;;  %v1074_v5 = vld [vmem:[%s1786_s1 + $0x28] sm:$0xff]  ;;  %vm223_vm0 = vcmask 261120  }
  0x17   : > { %v216_v1 = vld [vmem:[%s1786_s1 + $0x18] sm:$0xff]  ;;  %1175 = vmatprep.subr.mxu0 %v1443_v2  ;;  %1186 = vmatprep.subr.mxu1 %v1443_v2  ;;  %v215_v4 = vld [vmem:[%s1786_s1 + $0x10] sm:$0xff]  ;;  %v214_v6 = vld [vmem:[%s1786_s1 + $0x8] sm:$0xff]  ;;  %vm1444_vm1 = vmmov 0   ;;  %vm936_vm2 = vcmask 254976  }
  0x18   : > { %1176 = vmatpush3.msra.mxu0 %v1076_v0  ;;  %1187 = vmatpush3.msra.mxu1 %v216_v1  ;;  %s1129_s9 = sshll.u32 %s206_s24, 4  ;;  %v1073_v7 = vld [vmem:[%s1786_s1 + $0x20] sm:$0xff]  ;;  %v1082_v11 = vld [vmem:[%s1786_s1 + $0x58] sm:$0xff]  ;;  %v1081_v12 = vld [vmem:[%s1786_s1 + $0x50] sm:$0xff] }
  0x19   : > { %1177 = vmatprep.subr.mxu0 %v1443_v2  ;;  %1188 = vmatprep.subr.mxu1 %v1443_v2  ;;  %s209_s14 = scalar_lea.vmem %s1785_s0, %s1129_s9  ;;  %v213_v8 = vld [vmem:[%s1786_s1] sm:$0xff]  ;;  %v1089_v13 = vld [vmem:[%s1786_s1 + $0x78] sm:$0xff]  ;;  %v1080_v14 = vld [vmem:[%s1786_s1 + $0x48] sm:$0xff] }
  0x1a   : > { %1178 = vmatpush3.msra.mxu0 %v1075_v3  ;;  %1189 = vmatpush3.msra.mxu1 %v215_v4  ;;  %s1575_s23 = scalar_lea.vmem %s209_s14, %s1072_s8  ;;  %v1088_v15 = vld [vmem:[%s1786_s1 + $0x70] sm:$0xff]  ;;  %v1079_v16 = vld [vmem:[%s1786_s1 + $0x40] sm:$0xff]  ;;  %v1087_v17 = vld [vmem:[%s1786_s1 + $0x68] sm:$0xff]  ;;  %s1125_s14 = sshll.u32 %s1429_s19, 1 }
  0x1b   : > { %1179 = vmatprep.subr.mxu0 %v1443_v2  ;;  %1190 = vmatprep.subr.mxu1 %v1443_v2  ;;  %v217_v9 = vld [vmem:[%s1575_s23 + $0x1] sm:$0x3]  ;;  %v1095_v20 = vld [vmem:[%s1786_s1 + $0x98] sm:$0xff]  ;;  %v1085_v21 = vld [vmem:[%s1575_s23 + $0x4] sm:$0x3]  ;;  %s980_s24 = sadd.s32 %s1425_s18, %s1125_s14 }
  0x1c   : > { %1180 = vmatpush3.msra.mxu0 %v1074_v5  ;;  %1191 = vmatpush3.msra.mxu1 %v214_v6  ;;  %v212_v10 = vld [vmem:[%s1575_s23] sm:$0x3]  ;;  %v370_v18 = vld [vmem:[%s1575_s23 + $0x2] sm:$0x3]  ;;  %v1094_v22 = vld [vmem:[%s1786_s1 + $0x90] sm:$0xff]  ;;  %s1126_s8 = sshll.u32 %s980_s24, 5 }
  0x1d   : > { %1181 = vmatprep.subr.mxu0 %v1443_v2  ;;  %1183 = vmatprep.mubr.msk.f32.mxu0 %vm1444_vm1, %v1443_v2  ;;  %v1086_v19 = vld [vmem:[%s1786_s1 + $0x60] sm:$0xff]  ;;  %v1101_v23 = vld [vmem:[%s1786_s1 + $0xb8] sm:$0xff]  ;;  %v1093_v24 = vld [vmem:[%s1786_s1 + $0x88] sm:$0xff]  ;;  %s982_s18 = scalar_lea.hbm %s1789_s4, %s1126_s8 }
  0x1e   : > { %1182 = vmatpush3.msra.mxu0 %v1073_v7  ;;  %1192 = vmatprep.subr.mxu1 %v1443_v2  ;;  %v1100_v25 = vld [vmem:[%s1786_s1 + $0xb0] sm:$0xff]  ;;  %v1092_v26 = vld [vmem:[%s1786_s1 + $0x80] sm:$0xff]  ;;  %v1099_v27 = vld [vmem:[%s1786_s1 + $0xa8] sm:$0xff] }
  0x1f   : > { %1184 = vmatmul.mubr.msk.f32.vlgmr.msra.gmra.mxu0 %vm223_vm0, %v217_v9  ;;  %1193 = vmatpush3.msra.mxu1 %v213_v8  ;;  %v1091_v28 = vld [vmem:[%s1575_s23 + $0x5] sm:$0x3]  ;;  %v1108_v30 = vld [vmem:[%s1786_s1 + $0xd8] sm:$0xff]  ;;  %v1107_v32 = vld [vmem:[%s1786_s1 + $0xd0] sm:$0xff] }
  0x20   : > { %1194 = vmatprep.mubr.msk.f32.mxu1 %vm1444_vm1, %v1443_v2  ;;  %1197 = vmatprep.subr.mxu0 %v1443_v2  ;;  %v1098_v29 = vld [vmem:[%s1786_s1 + $0xa0] sm:$0xff]  ;;  %v1114_v33 = vld [vmem:[%s1786_s1 + $0xf8] sm:$0xff]  ;;  %v1106_v34 = vld [vmem:[%s1786_s1 + $0xc8] sm:$0xff] }
  0x21   : > { %1195 = vmatmul.mubr.msk.f32.vlgmr.msra.gmra.mxu1 %vm223_vm0, %v212_v10  ;;  %1198 = vmatpush3.msra.mxu0 %v1082_v11  ;;  %v1097_v31 = vld [vmem:[%s1575_s23 + $0x6] sm:$0x3]  ;;  %v1113_v35 = vld [vmem:[%s1786_s1 + $0xf0] sm:$0xff]  ;;  %v1112_v37 = vld [vmem:[%s1786_s1 + $0xe8] sm:$0xff] }
  0x22   : > { %1199 = vmatprep.subr.mxu0 %v1443_v2  ;;  %1208 = vmatprep.subr.mxu1 %v1443_v2  ;;  %v1105_v36 = vld [vmem:[%s1786_s1 + $0xc0] sm:$0xff]  ;;  %v1104_v38 = vld [vmem:[%s1575_s23 + $0x8] sm:$0x3]  ;;  %v1120_v40 = vld [vmem:[%s1786_s1 + $0x118] sm:$0xff] }
  0x23   : > { %1200 = vmatpush3.msra.mxu0 %v1081_v12  ;;  %1209 = vmatpush3.msra.mxu1 %v1089_v13  ;;  %v1111_v39 = vld [vmem:[%s1786_s1 + $0xe0] sm:$0xff]  ;;  %v1110_v41 = vld [vmem:[%s1575_s23 + $0x9] sm:$0x3]  ;;  %v1119_v42 = vld [vmem:[%s1786_s1 + $0x110] sm:$0xff] }
  0x24   : > { %1201 = vmatprep.subr.mxu0 %v1443_v2  ;;  %1210 = vmatprep.subr.mxu1 %v1443_v2  ;;  %v1118_v43 = vld [vmem:[%s1786_s1 + $0x108] sm:$0xff]  ;;  %v1117_v44 = vld [vmem:[%s1786_s1 + $0x100] sm:$0xff] }
  0x25   : > { %1202 = vmatpush3.msra.mxu0 %v1080_v14  ;;  %1211 = vmatpush3.msra.mxu1 %v1088_v15  ;;  %v1116_v45 = vld [vmem:[%s1575_s23 + $0xa] sm:$0x3]  ;;  %s202_s23 = sand.u32 1, %s1417_s16  }
  0x26   : > { %1203 = vmatprep.subr.mxu0 %v1443_v2  ;;  %1212 = vmatprep.subr.mxu1 %v1443_v2  ;;  %s1069_s13 = sshll.u32 %s202_s23, 1  ;;  %s969_s19 = scalar_lea.sflag [#allocation3], %s202_s23 }
  0x27   : > { %1204 = vmatpush3.msra.mxu0 %v1079_v16  ;;  %1205 = vmatprep.mubr.msk.f32.mxu0 %vm1444_vm1, %v1443_v2  ;;  %s204_s9 = scalar_lea.vmem [#allocation2], %s1069_s13  ;;  %s1355_s13 = scalar_lea.vmem %s1354_s30, 64 }
  0x28   : > { %1213 = vmatpush3.msra.mxu1 %v1087_v17  ;;  %1206 = vmatmul.mubr.msk.f32.vlgmr.msra.gmra.mxu0 %vm223_vm0, %v370_v18  ;;  %v1122_v18 = vld [vmem:[%s1787_s2] ss:$0 sm:$0xff]  ;;  %s984_s10 = sshll.u32 %s204_s9, 4  ;;  %s985_s10 = int_to_ptr.vmem [resolvable:$true] %s984_s10 }
  0x29   : > { %1214 = vmatprep.subr.mxu1 %v1443_v2  ;;  %1219 = vmatprep.subr.mxu0 %v1443_v2  ;;  %s1349_s14 = scalar_lea.vmem %s985_s10, 32  ;;  %p1356_p2 = scmp.lt.s32.totalorder %s985_s10, %s1354_s30 }
  0x2a   : > { %1215 = vmatpush3.msra.mxu1 %v1086_v19  ;;  %1216 = vmatprep.mubr.msk.f32.mxu1 %vm1444_vm1, %v1443_v2  ;;  %p1350_p13 = scmp.ne.s32.totalorder %s985_s10, %s1349_s14  ;;  %p1357_p4 = scmp.lt.s32.totalorder %s1355_s13, %s1349_s14 }
  0x2b   : > { %1220 = vmatpush3.msra.mxu0 %v1095_v20  ;;  %1217 = vmatmul.mubr.msk.f32.vlgmr.msra.gmra.mxu1 %vm223_vm0, %v1085_v21  ;;  %v1123_v20 = vld [vmem:[%s1788_s3] ss:$0 sm:$0xff] }
  0x2c   : > { %1221 = vmatprep.subr.mxu0 %v1443_v2  ;;  %1230 = vmatprep.subr.mxu1 %v1443_v2  ;;  %p1351_p0 = pnand %p1350_p13, %p1522_p3  ;;  %p1358_p5 = por %p1357_p4, %p1356_p2 }
  0x2d   : > { %1222 = vmatpush3.msra.mxu0 %v1094_v22  ;;  %1231 = vmatpush3.msra.mxu1 %v1101_v23 }
  0x2e   : > { %1223 = vmatprep.subr.mxu0 %v1443_v2  ;;  %1232 = vmatprep.subr.mxu1 %v1443_v2  ;;  %p1352_p1 = pneg %p1351_p0 }
  0x2f   : > { %1224 = vmatpush3.msra.mxu0 %v1093_v24  ;;  %1233 = vmatpush3.msra.mxu1 %v1100_v25 }
  0x30   : > { %1225 = vmatprep.subr.mxu0 %v1443_v2  ;;  %1234 = vmatprep.subr.mxu1 %v1443_v2  ;;  %p1359_p6 = pnand %p1358_p5, %p1352_p1 }
  0x31   : > { %1226 = vmatpush3.msra.mxu0 %v1092_v26  ;;  %1227 = vmatprep.mubr.msk.f32.mxu0 %vm1444_vm1, %v1443_v2 }
  0x32   : > { %1235 = vmatpush3.msra.mxu1 %v1099_v27  ;;  %1228 = vmatmul.mubr.msk.f32.vlgmr.msra.gmra.mxu0 %vm223_vm0, %v1091_v28 }
  0x33   : > { %1236 = vmatprep.subr.mxu1 %v1443_v2  ;;  %1241 = vmatprep.subr.mxu0 %v1443_v2 }
  0x34   : > { %1237 = vmatpush3.msra.mxu1 %v1098_v29  ;;  %1238 = vmatprep.mubr.msk.f32.mxu1 %vm1444_vm1, %v1443_v2 }
  0x35   : > { %1242 = vmatpush3.msra.mxu0 %v1108_v30  ;;  %1239 = vmatmul.mubr.msk.f32.vlgmr.msra.gmra.mxu1 %vm223_vm0, %v1097_v31 }
  0x36   : > { %1243 = vmatprep.subr.mxu0 %v1443_v2  ;;  %1252 = vmatprep.subr.mxu1 %v1443_v2 }
  0x37   : > { %1244 = vmatpush3.msra.mxu0 %v1107_v32  ;;  %1253 = vmatpush3.msra.mxu1 %v1114_v33 }
  0x38   : > { %1245 = vmatprep.subr.mxu0 %v1443_v2  ;;  %1254 = vmatprep.subr.mxu1 %v1443_v2 }
  0x39   : > { %1246 = vmatpush3.msra.mxu0 %v1106_v34  ;;  %1255 = vmatpush3.msra.mxu1 %v1113_v35 }
  0x3a   : > { %1247 = vmatprep.subr.mxu0 %v1443_v2  ;;  %1256 = vmatprep.subr.mxu1 %v1443_v2 }
  0x3b   : > { %1248 = vmatpush3.msra.mxu0 %v1105_v36  ;;  %1249 = vmatprep.mubr.msk.f32.mxu0 %vm1444_vm1, %v1443_v2 }
  0x3c   : > { %1257 = vmatpush3.msra.mxu1 %v1112_v37  ;;  %1250 = vmatmul.mubr.msk.f32.vlgmr.msra.gmra.mxu0 %vm223_vm0, %v1104_v38 }
  0x3d   : > { %1258 = vmatprep.subr.mxu1 %v1443_v2  ;;  %1263 = vmatprep.subr.mxu0 %v1443_v2 }
  0x3e   : > { %1259 = vmatpush3.msra.mxu1 %v1111_v39  ;;  %1260 = vmatprep.mubr.msk.f32.mxu1 %vm1444_vm1, %v1443_v2 }
  0x3f   : > { %1264 = vmatpush3.msra.mxu0 %v1120_v40  ;;  %1261 = vmatmul.mubr.msk.f32.vlgmr.msra.gmra.mxu1 %vm223_vm0, %v1110_v41 }
  0x40   : > { %1265 = vmatprep.subr.mxu0 %v1443_v2  ;;  %1271 = vmatprep.mubr.msk.f32.mxu0 %vm1444_vm1, %v1443_v2 }
  0x41   : > { %1266 = vmatpush3.msra.mxu0 %v1119_v42 }
  0x42   : > { %1267 = vmatprep.subr.mxu0 %v1443_v2 }
  0x43   : > { %1268 = vmatpush3.msra.mxu0 %v1118_v43 }
  0x44   : > { %1269 = vmatprep.subr.mxu0 %v1443_v2 }
  0x45   : > { %1270 = vmatpush3.msra.mxu0 %v1117_v44 }
  0x46   : > { %1272 = vmatmul.mubr.msk.f32.vlgmr.msra.gmra.mxu0 %vm223_vm0, %v1116_v45 }
  0xdf   : > { %v293_v46 = vpop.f32.mrf.mxu0 }
  0xe1   : > { %v366_v47 = vpop.f32.mrf.mxu1  ;;  %v1185_v48 = vpop.f32.mrf.mxu0 }
  0xe2   : > { %v367_v55 = vadd.f32 %v366_v47, %v293_v46 }
  0xe3   : > { %v1196_v49 = vpop.f32.mrf.mxu1 }
  0xe8   : > { %v445_v50 = vpop.f32.mrf.mxu0 }
  0xe9   : > { %v449_v57 = vadd.f32 %v445_v50, %v367_v55 }
  0xea   : > { %v1207_v51 = vpop.f32.mrf.mxu0 }
  0xeb   : > { %v528_v52 = vpop.f32.mrf.mxu1 }
  0xec   : > { %v532_v60 = vadd.f32 %v528_v52, %v449_v57 }
  0xed   : > { %v1218_v53 = vpop.f32.mrf.mxu1 }
  0xf2   : > { %v608_v54 = vpop.f32.mrf.mxu0 }
  0xf3   : > { %v612_v61 = vadd.f32 %v608_v54, %v532_v60 }
  0xf4   : > { %v1229_v56 = vpop.f32.mrf.mxu0 }
  0xf5   : > { %v688_v58 = vpop.f32.mrf.mxu1 }
  0xf6   : > { %v692_v0 = vadd.f32 %v688_v58, %v612_v61 }
  0xf7   : > { %v1240_v59 = vpop.f32.mrf.mxu1 }
  0xfc   : > { %v771_v62 = vpop.f32.mrf.mxu0 }
  0xfd   : > { %v775_v2 = vadd.f32 %v771_v62, %v692_v0 }
  0xfe   : > { %v1251_v63 = vpop.f32.mrf.mxu0 }
  0xff   : > { %v851_v1 = vpop.f32.mrf.mxu1 }
 0x100   : > { %v855_v4 = vadd.f32 %v851_v1, %v775_v2 }
 0x101   : > { %v1262_v3 = vpop.f32.mrf.mxu1 }
 0x106   : > { %v931_v5 = vpop.f32.mrf.mxu0 }
 0x107   : > { %v935_v6 = vadd.f32 %v931_v5, %v855_v4 }
 0x108   : > { %v1273_v7 = vpop.f32.mrf.mxu0 }
 0x109   : > { %v937_v8 = vsel %vm936_vm2, %v935_v6, 0.0 }
 0x10a   : > { %938 = vadd.xlane.f32.xlu0 %v937_v8 }
 0x193   : > { %v939_v9 = vpop.xlane.xlu0 %938 }
 0x194   : > { %v941_v10 = vmul.f32 0.03125, %v939_v9 }
 0x196   : > { %v942_v11 = vsub.f32 %v935_v6, %v941_v10 }
 0x198   : > { %v943_v12 = vmul.f32 %v942_v11, %v942_v11 }
 0x19a   : > { %v944_v13 = vsel %vm936_vm2, %v943_v12, 0.0 }
 0x19b   : > { %945 = vadd.xlane.f32.xlu0 %v944_v13 }
 0x224   : > { %v946_v14 = vpop.xlane.xlu0 %945 }
 0x225   : > { %v947_v15 = vmul.f32 0.03125, %v946_v14 }
 0x227   : > { %v948_v16 = vadd.f32 1e-06, %v947_v15 }
 0x229   : > { %1347 = vrsqrt.f32 %v948_v16 }
 0x236   : > { %v1348_v17 = vpop.eup %1347 }
 0x237   : > { %v950_v19 = vmul.f32 %v1348_v17, %v942_v11 }
 0x239   : > { %v958_v21 = vmul.f32 %v1122_v18, %v950_v19 }
 0x23b   : > { %v966_v22 = vadd.f32 %v1123_v20, %v958_v21 }
 0x23d   : > { %967 = vst.msk [vmem:[%s204_s9] sm:$0x3] %vm936_vm2, %v966_v22 }
 0x23e   : > { %1362 = shalt.err (!%p1359_p6)
}
 0x23f   : > { %s1363_s24 = scalar_lea.hbm %s982_s18, 32  ;;  %s1367_s6 = scalar_lea.hbm %s1789_s4, 128 }
 0x240   : > { %p1364_p7 = scmp.ne.s32.totalorder %s982_s18, %s1363_s24  ;;  %p1368_p11 = scmp.lt.s32.totalorder %s982_s18, %s1789_s4 }
 0x241   : > { %p1369_p12 = scmp.lt.s32.totalorder %s1367_s6, %s1363_s24 }
 0x242   : > { %p1365_p9 = pnand %p1364_p7, %p1522_p3 }
 0x243   : > { %p1370_p13 = por %p1369_p12, %p1368_p11 }
 0x244   : > { %p1366_p10 = pneg %p1365_p9 }
 0x246   : > { %p1371_p0 = pnand %p1370_p13, %p1366_p10 }
 0x248   : > { %1374 = shalt.err (!%p1371_p0)
}
 0x249   : > { %1274 = dma.vmem_to_hbm [thread:$0]  (%p1522_p3), %s985_s10, 32, %s982_s18, %s969_s19  }
 0x24a PF: > { %p1280_p1 = scmp.ge.s32.totalorder %s1441_s22, 2  ;;  %s996_s11 = sand.u32 1, %s1413_s15  }
 0x24b   : > { %s997_s12 = scalar_lea.sflag [#allocation3], %s996_s11 }
 0x24c   : > { %p1277_p2 = pnand %p1280_p1, %p1531_p8 }
 0x24e   : > { %p1278_p4 = pneg %p1277_p2 }
 0x250   : > { %1408 = dma.done.wait (%p1278_p4), %s997_s12, 32  }
 0x251   : > { %1410 = vsyncadd (%p1278_p4), %s997_s12, 4294967264  ;;  %s17_s22 = sadd.s32 1, %s1441_s22   ;;  %s1792_s15 = smov %s1417_s16 }
 0x252   : > { %p14_p5 = scmp.ge.s32.totalorder %s17_s22, 6   ;;  %s1793_s16 = smov %s1421_s17 }
 0x253   : > { %s1794_s17 = smov %s1540_s7  ;;  %s1795_s18 = smov %s1433_s20 }
 0x254   : > { %s1796_s19 = smov %s1437_s21  ;;  %s1797_s20 = smov %s1800_s25 }
 0x255   : > { %s1798_s21 = smov %s1804_s26  ;;  %16 = sbr.rel (!%p14_p5) target bundleno = 5 (0x5), region = 82 }
 0x25a   :  { %1002 = vsyncpa [#allocation3], 1 }
 0x25b   :  { %1004 = vsyncpa [#allocation3 + $0x1], 1 }

</bundles_post_ra>
